<compile_context>
chip_gen: v6e
topology: v6e:2x2x1
jax: 0.10.0
libtpu: 0.0.40
codegen_flags: <defaults>
</compile_context>

<pallas_src>
import numpy as np
import jax
import jax.numpy as jnp
from jax.experimental import pallas as pl
from jax.experimental.pallas import tpu as pltpu


# ----------------------------------------------------------------------------
# Bilinear x2 interpolation matrices (align_corners=True), built on the host.
# ----------------------------------------------------------------------------
def _bilinear_matrix(n_in, n_out):
    """Interpolation matrix R (n_out, n_in): out = R @ in, align_corners=True."""
    i = np.arange(n_out)
    if n_out == 1:
        src = np.zeros(n_out, dtype=np.float64)
    else:
        src = i * (n_in - 1) / (n_out - 1)
    i0 = np.clip(np.floor(src).astype(np.int64), 0, n_in - 1)
    i1 = np.minimum(i0 + 1, n_in - 1)
    frac = (src - i0).astype(np.float32)
    R = np.zeros((n_out, n_in), dtype=np.float32)
    R[np.arange(n_out), i0] += (1.0 - frac)
    R[np.arange(n_out), i1] += frac
    return jnp.asarray(R)


# ----------------------------------------------------------------------------
# Fused kernel: upsample(x) ++ x_skip  ->  conv3x3+ReLU  ->  conv3x3+ReLU.
# ----------------------------------------------------------------------------
def _make_fused_kernel(Cx, Cskip, Cout, H, W):
    Hout, Wout = 2 * H, 2 * W
    HW = Hout * Wout
    f32 = jnp.float32
    bf16 = jnp.bfloat16

    def kernel(x_ref, xs_ref, rh_ref, rwt_ref, w1x_ref, w1s_ref, w2_ref,
               b1_ref, b2_ref, o_ref):
        # ---- bilinear x2 upsample (align_corners=True) of the low-res input ----
        x = x_ref[0].astype(f32)                                   # (Cx, H, W)
        xw = jnp.dot(x.reshape(Cx * H, W), rwt_ref[...],
                     preferred_element_type=f32)                   # (Cx*H, Wout)
        xw = xw.reshape(Cx, H, Wout)
        rh_b = jnp.broadcast_to(rh_ref[...], (Cx, Hout, H))
        xu = jax.lax.dot_general(                                  # (Cx, Hout, Wout)
            rh_b, xw, (((2,), (1,)), ((0,), (0,))),
            preferred_element_type=f32)
        xu = xu.reshape(Cx, HW)                                    # flat lane-dense slab

        xs = xs_ref[0].astype(f32)                                 # (Cskip, HW)

        # ---- halo masks on the flat HW index (shared by both convs) -----------
        pos = jax.lax.broadcasted_iota(jnp.int32, (1, HW), 1)
        col = pos % Wout
        row_ok = {0: pos >= Wout, 1: None, 2: pos < (Hout - 1) * Wout}
        col_ok = {0: col >= 1, 1: None, 2: col <= Wout - 2}

        def tap(a, dy, dx):
            """tap[k] = a[k + s] with out-of-image neighbours zeroed; s=(dy-1)*Wout+(dx-1)."""
            s = (dy - 1) * Wout + (dx - 1)
            v = a if s == 0 else pltpu.roll(a, (-s) % HW, axis=1)
            m = row_ok[dy]
            mc = col_ok[dx]
            if m is None:
                m = mc
            elif mc is not None:
                m = jnp.logical_and(m, mc)
            if m is not None:
                v = jnp.where(m, v, 0.0)
            return v.astype(bf16)

        def conv3x3_acc(acc, w_taps_ref, a):
            # 9 accumulated (Cout, C) @ (C, HW) matmuls; rolls ride the XLU slot.
            for t in range(9):
                dy, dx = t // 3, t % 3
                acc = acc + jnp.dot(w_taps_ref[t], tap(a, dy, dx),
                                    preferred_element_type=f32)
            return acc

        # ---- conv1 + ReLU: K split into upsampled-x and skip blocks (no concat) --
        acc1 = jnp.zeros((Cout, HW), f32)
        acc1 = conv3x3_acc(acc1, w1x_ref, xu)
        acc1 = conv3x3_acc(acc1, w1s_ref, xs)
        h1 = jnp.maximum(acc1 + b1_ref[...], 0.0)                  # (Cout, HW) f32

        # ---- conv2 + ReLU --------------------------------------------------------
        acc2 = jnp.zeros((Cout, HW), f32)
        acc2 = conv3x3_acc(acc2, w2_ref, h1)
        h2 = jnp.maximum(acc2 + b2_ref[...], 0.0)                  # (Cout, HW) f32

        # Lane-dense store: last dim HW is a multiple of 128.
        o_ref[0] = h2.astype(o_ref.dtype)

    return kernel


def upsample_concat_double_conv(x, x_skip, w1, b1, w2, b2):
    """Fused bilinear x2 upsample + skip concat + DoubleConv (conv2d branch).

    x:      (N, Cx, H, W)          NCHW
    x_skip: (N, Cskip, 2H, 2W)     NCHW
    w1:     (3, 3, Cx+Cskip, Cout) HWIO      w2: (3, 3, Cout, Cout) HWIO
    returns (N, Cout, 2H, 2W)      NCHW
    """
    N, Cx, H, W = x.shape
    Ns, Cskip, Hout, Wout = x_skip.shape
    assert Ns == N and Hout == 2 * H and Wout == 2 * W
    Cin = Cx + Cskip
    Cout = w1.shape[-1]
    HW = Hout * Wout

    rh = _bilinear_matrix(H, Hout)               # (Hout, H) f32
    rwt = _bilinear_matrix(W, Wout).T            # (W, Wout) f32

    # Per-tap weight blocks (9, Cout, C) in bf16; conv1 split into xu / skip K-blocks.
    w1_taps = jnp.transpose(w1.reshape(9, Cin, Cout), (0, 2, 1)).astype(jnp.bfloat16)
    w1x = w1_taps[:, :, :Cx]                     # (9, Cout, Cx)
    w1s = w1_taps[:, :, Cx:]                     # (9, Cout, Cskip)
    w2_taps = jnp.transpose(w2.reshape(9, Cout, Cout), (0, 2, 1)).astype(jnp.bfloat16)
    b1_2d = b1.reshape(Cout, 1).astype(jnp.float32)
    b2_2d = b2.reshape(Cout, 1).astype(jnp.float32)

    # Lane-dense skip input: (N, Cskip, HW), HW multiple of 128 -> clean DMAs.
    xs_flat = x_skip.reshape(N, Cskip, HW)

    flops = 2 * N * (Cx * H * W * Wout                 # width interp
                     + Cx * Hout * H * Wout            # height interp
                     + 9 * Cin * Cout * HW             # conv1
                     + 9 * Cout * Cout * HW)           # conv2
    bytes_accessed = int(
        x.size * x.dtype.itemsize + xs_flat.size * xs_flat.dtype.itemsize
        + (w1x.size + w1s.size + w2_taps.size) * 2
        + (b1_2d.size + b2_2d.size + rh.size + rwt.size) * 4
        + N * Cout * HW * x.dtype.itemsize)

    kernel = _make_fused_kernel(Cx, Cskip, Cout, H, W)
    out = pl.pallas_call(
        kernel,
        out_shape=jax.ShapeDtypeStruct((N, Cout, HW), x.dtype),
        grid=(N,),
        in_specs=[
            pl.BlockSpec((1, Cx, H, W), lambda n: (n, 0, 0, 0)),
            pl.BlockSpec((1, Cskip, HW), lambda n: (n, 0, 0)),
            pl.BlockSpec((Hout, H), lambda n: (0, 0)),
            pl.BlockSpec((W, Wout), lambda n: (0, 0)),
            pl.BlockSpec((9, Cout, Cx), lambda n: (0, 0, 0)),
            pl.BlockSpec((9, Cout, Cskip), lambda n: (0, 0, 0)),
            pl.BlockSpec((9, Cout, Cout), lambda n: (0, 0, 0)),
            pl.BlockSpec((Cout, 1), lambda n: (0, 0)),
            pl.BlockSpec((Cout, 1), lambda n: (0, 0)),
        ],
        out_specs=pl.BlockSpec((1, Cout, HW), lambda n: (n, 0, 0)),
        compiler_params=pltpu.CompilerParams(
            dimension_semantics=("parallel",)),
        cost_estimate=pl.CostEstimate(flops=flops, transcendentals=0,
                                      bytes_accessed=bytes_accessed),
    )(x, xs_flat, rh, rwt, w1x, w1s, w2_taps, b1_2d, b2_2d)
    # (N, Cout, HW) lane-dense slab -> NCHW; pure layout plumbing in the wrapper.
    return out.reshape(N, Cout, Hout, Wout)


# ----------------------------------------------------------------------------
# Standalone bilinear x2 upsample (used for the mask in the 'partial' path).
# Lane-dense (N, C, HW) output slab, reshaped to NCHW in the wrapper.
# ----------------------------------------------------------------------------
def _upsample_kernel(x_ref, rh_ref, rwt_ref, o_ref):
    _, C, H, W = x_ref.shape
    Hout = rh_ref.shape[0]
    Wout = rwt_ref.shape[1]
    x = x_ref[0].astype(jnp.float32)
    xw = jnp.dot(x.reshape(C * H, W), rwt_ref[...],
                 preferred_element_type=jnp.float32).reshape(C, H, Wout)
    rh_b = jnp.broadcast_to(rh_ref[...], (C, Hout, H))
    xu = jax.lax.dot_general(rh_b, xw, (((2,), (1,)), ((0,), (0,))),
                             preferred_element_type=jnp.float32)
    o_ref[0] = xu.reshape(C, Hout * Wout).astype(o_ref.dtype)


def bilinear_upsample_x2(x):
    """x: (N, C, H, W) -> (N, C, 2H, 2W), bilinear, align_corners=True."""
    N, C, H, W = x.shape
    Hout, Wout = 2 * H, 2 * W
    rh = _bilinear_matrix(H, Hout)
    rwt = _bilinear_matrix(W, Wout).T
    out = pl.pallas_call(
        _upsample_kernel,
        out_shape=jax.ShapeDtypeStruct((N, C, Hout * Wout), x.dtype),
        grid=(N,),
        in_specs=[
            pl.BlockSpec((1, C, H, W), lambda n: (n, 0, 0, 0)),
            pl.BlockSpec((Hout, H), lambda n: (0, 0)),
            pl.BlockSpec((W, Wout), lambda n: (0, 0)),
        ],
        out_specs=pl.BlockSpec((1, C, Hout * Wout), lambda n: (n, 0, 0)),
        compiler_params=pltpu.CompilerParams(dimension_semantics=("parallel",)),
    )(x, rh, rwt)
    return out.reshape(N, C, Hout, Wout)


# ----------------------------------------------------------------------------
# UpSampleBlock forward (netType without 'partial', convType 'conv2d').
# ----------------------------------------------------------------------------
def upsample_block_forward(params, x, m, x_skip, m_skip, net_type="conv2d"):
    # x, m, x_skip, m_skip in NCHW (PyTorch convention).
    if "partial" in net_type:
        m = bilinear_upsample_x2(m)
        # TODO(synk): PartialConv2d (mask-normalised conv) path not implemented;
        # only the standard Conv2d branch of DoubleConv is supported.
    x = upsample_concat_double_conv(x, x_skip, params["w1"], params["b1"],
                                    params["w2"], params["b2"])
    return x, m


def init_params(key, in_channels, out_channels):
    # PyTorch-style init (bound = 1/sqrt(fan_in)), weights stored HWIO.
    k1, k2, k3, k4 = jax.random.split(key, 4)
    b1_bound = 1.0 / np.sqrt(in_channels * 9)
    b2_bound = 1.0 / np.sqrt(out_channels * 9)
    w1 = jax.random.uniform(k1, (3, 3, in_channels, out_channels), jnp.float32,
                            -b1_bound, b1_bound)
    b1 = jax.random.uniform(k2, (out_channels,), jnp.float32, -b1_bound, b1_bound)
    w2 = jax.random.uniform(k3, (3, 3, out_channels, out_channels), jnp.float32,
                            -b2_bound, b2_bound)
    b2 = jax.random.uniform(k4, (out_channels,), jnp.float32, -b2_bound, b2_bound)
    return dict(w1=w1, b1=b1, w2=w2, b2=b2)


# ----------------------------------------------------------------------------
# Pure-JAX/XLA reference for a numerical sanity check.
# ----------------------------------------------------------------------------
def _reference_forward(params, x, x_skip):
    N, Cx, H, W = x.shape
    Hout, Wout = 2 * H, 2 * W
    rh = _bilinear_matrix(H, Hout)
    rw = _bilinear_matrix(W, Wout)
    xu = jnp.einsum("oh,nchw,vw->ncov", rh, x, rw)
    xc = jnp.concatenate([xu, x_skip], axis=1)

    def conv_relu(z, w_hwio, b):
        y = jax.lax.conv_general_dilated(
            z, w_hwio, window_strides=(1, 1), padding=((1, 1), (1, 1)),
            dimension_numbers=("NCHW", "HWIO", "NCHW"))
        return jax.nn.relu(y + b[None, :, None, None])

    h = conv_relu(xc, params["w1"], params["b1"])
    h = conv_relu(h, params["w2"], params["b2"])
    return h


if __name__ == "__main__":
    key = jax.random.PRNGKey(0)
    kx, kxs, km, kms, kp = jax.random.split(key, 5)

    N, Cx, H, W = 2, 4, 8, 8        # low-res feature map -> upsampled to 16x16
    Cskip = 4                       # skip-connection channels
    in_channels = Cx + Cskip        # channels entering DoubleConv after concat
    out_channels = 4

    x = jax.random.normal(kx, (N, Cx, H, W), jnp.float32)
    x_skip = jax.random.normal(kxs, (N, Cskip, 2 * H, 2 * W), jnp.float32)
    m = jax.random.uniform(km, (N, 1, H, W), jnp.float32)
    m_skip = jax.random.uniform(kms, (N, 1, 2 * H, 2 * W), jnp.float32)

    params = init_params(kp, in_channels, out_channels)

    out_x, out_m = upsample_block_forward(params, x, m, x_skip, m_skip,
                                          net_type="conv2d")
    jax.block_until_ready((out_x, out_m))

    assert out_x.shape == (N, out_channels, 2 * H, 2 * W)
    assert out_m.shape == m.shape

    # Numerical sanity check vs XLA reference (loose tolerance: conv matmuls run
    # with bf16 operands / f32 accumulation on the MXU).
    ref_x = _reference_forward(params, x, x_skip)
    np.testing.assert_allclose(np.asarray(out_x), np.asarray(ref_x),
                               rtol=5e-2, atol=5e-2)

    print("KERNEL_OK")
</pallas_src>

<mosaic_0001>
module attributes {stable_mosaic.version = 11 : i64} {
  func.func @kernel(%arg0: i32, %arg1: memref<1x4x8x8xf32, #tpu.memory_space<vmem>>, %arg2: memref<1x4x256xf32, #tpu.memory_space<vmem>>, %arg3: memref<16x8xf32, #tpu.memory_space<vmem>>, %arg4: memref<8x16xf32, #tpu.memory_space<vmem>>, %arg5: memref<9x4x4xbf16, #tpu.memory_space<vmem>>, %arg6: memref<9x4x4xbf16, #tpu.memory_space<vmem>>, %arg7: memref<9x4x4xbf16, #tpu.memory_space<vmem>>, %arg8: memref<4x1xf32, #tpu.memory_space<vmem>>, %arg9: memref<4x1xf32, #tpu.memory_space<vmem>>, %arg10: memref<1x4x256xf32, #tpu.memory_space<vmem>>) attributes {dimension_semantics = [#tpu.dimension_semantics<parallel>], iteration_bounds = array<i64: 2>, scalar_prefetch = 0 : i64, scratch_operands = 0 : i64, tpu.core_type = #tpu.core_type<tc>, window_params = [{transform_indices = @transform_0, window_bounds = array<i64: 1, 4, 8, 8>}, {transform_indices = @transform_1, window_bounds = array<i64: 1, 4, 256>}, {pipeline_mode = #tpu.pipeline_mode<synchronous>, transform_indices = @transform_2, window_bounds = array<i64: 16, 8>}, {pipeline_mode = #tpu.pipeline_mode<synchronous>, transform_indices = @transform_3, window_bounds = array<i64: 8, 16>}, {pipeline_mode = #tpu.pipeline_mode<synchronous>, transform_indices = @transform_4, window_bounds = array<i64: 9, 4, 4>}, {pipeline_mode = #tpu.pipeline_mode<synchronous>, transform_indices = @transform_5, window_bounds = array<i64: 9, 4, 4>}, {pipeline_mode = #tpu.pipeline_mode<synchronous>, transform_indices = @transform_6, window_bounds = array<i64: 9, 4, 4>}, {pipeline_mode = #tpu.pipeline_mode<synchronous>, transform_indices = @transform_7, window_bounds = array<i64: 4, 1>}, {pipeline_mode = #tpu.pipeline_mode<synchronous>, transform_indices = @transform_8, window_bounds = array<i64: 4, 1>}, {transform_indices = @transform_9, window_bounds = array<i64: 1, 4, 256>}]} {
    %c0 = arith.constant 0 : index
    %c0_0 = arith.constant 0 : index
    %c0_1 = arith.constant 0 : index
    %c0_2 = arith.constant 0 : index
    %0 = vector.load %arg1[%c0, %c0_0, %c0_1, %c0_2] : memref<1x4x8x8xf32, #tpu.memory_space<vmem>>, vector<1x4x8x8xf32>
    %1 = vector.shape_cast %0 : vector<1x4x8x8xf32> to vector<4x8x8xf32>
    %2 = vector.shape_cast %1 : vector<4x8x8xf32> to vector<32x8xf32>
    %c0_3 = arith.constant 0 : index
    %c0_4 = arith.constant 0 : index
    %3 = vector.load %arg4[%c0_3, %c0_4] : memref<8x16xf32, #tpu.memory_space<vmem>>, vector<8x16xf32>
    %cst = arith.constant dense<0.000000e+00> : vector<32x16xf32>
    %4 = tpu.matmul %2, %3, %cst {dimension_numbers = #tpu.dot_dimension_numbers<[1], [0], [0], [1], [0, 0, 1, 1], [], []>} : vector<32x8xf32>, vector<8x16xf32>, vector<32x16xf32> -> vector<32x16xf32>
    %5 = vector.shape_cast %4 : vector<32x16xf32> to vector<4x8x16xf32>
    %c0_5 = arith.constant 0 : index
    %c0_6 = arith.constant 0 : index
    %6 = vector.load %arg3[%c0_5, %c0_6] : memref<16x8xf32, #tpu.memory_space<vmem>>, vector<16x8xf32>
    %7 = vector.shape_cast %6 : vector<16x8xf32> to vector<1x16x8xf32>
    %8 = vector.broadcast %7 : vector<1x16x8xf32> to vector<4x16x8xf32>
    %cst_7 = arith.constant dense<0.000000e+00> : vector<4x16x16xf32>
    %9 = tpu.matmul %8, %5, %cst_7 {dimension_numbers = #tpu.dot_dimension_numbers<[2], [1], [1], [2], [0, 0, 0, 1, 1, 2], [0], [0]>} : vector<4x16x8xf32>, vector<4x8x16xf32>, vector<4x16x16xf32> -> vector<4x16x16xf32>
    %10 = vector.shape_cast %9 : vector<4x16x16xf32> to vector<4x256xf32>
    %c0_8 = arith.constant 0 : index
    %c0_9 = arith.constant 0 : index
    %c0_10 = arith.constant 0 : index
    %11 = vector.load %arg2[%c0_8, %c0_9, %c0_10] : memref<1x4x256xf32, #tpu.memory_space<vmem>>, vector<1x4x256xf32>
    %12 = vector.shape_cast %11 : vector<1x4x256xf32> to vector<4x256xf32>
    %13 = tpu.iota {dimensions = array<i32: 1>} : vector<1x256xi32>
    %c16_i32 = arith.constant 16 : i32
    %c0_i32 = arith.constant 0 : i32
    %14 = arith.cmpi eq, %c16_i32, %c0_i32 : i32
    %c1_i32 = arith.constant 1 : i32
    %15 = arith.select %14, %c1_i32, %c16_i32 : i32
    %16 = vector.broadcast %15 : i32 to vector<1x256xi32>
    %17 = arith.remsi %13, %16 : vector<1x256xi32>
    %c0_i32_11 = arith.constant 0 : i32
    %18 = vector.broadcast %c0_i32_11 : i32 to vector<1x256xi32>
    %19 = arith.cmpi ne, %17, %18 : vector<1x256xi32>
    %c0_i32_12 = arith.constant 0 : i32
    %20 = vector.broadcast %c0_i32_12 : i32 to vector<1x256xi32>
    %21 = arith.cmpi slt, %17, %20 : vector<1x256xi32>
    %c0_i32_13 = arith.constant 0 : i32
    %22 = arith.cmpi slt, %15, %c0_i32_13 : i32
    %23 = vector.broadcast %22 : i1 to vector<1x256xi1>
    %24 = vector.broadcast %23 : vector<1x256xi1> to vector<1x256xi1>
    %25 = arith.xori %21, %24 : vector<1x256xi1>
    %26 = arith.andi %25, %19 : vector<1x256xi1>
    %27 = vector.broadcast %15 : i32 to vector<1x256xi32>
    %28 = arith.addi %17, %27 : vector<1x256xi32>
    %29 = arith.select %26, %28, %17 : vector<1x256xi1>, vector<1x256xi32>
    %c16_i32_14 = arith.constant 16 : i32
    %30 = vector.broadcast %c16_i32_14 : i32 to vector<1x256xi32>
    %31 = arith.cmpi sge, %13, %30 : vector<1x256xi32>
    %c240_i32 = arith.constant 240 : i32
    %32 = vector.broadcast %c240_i32 : i32 to vector<1x256xi32>
    %33 = arith.cmpi slt, %13, %32 : vector<1x256xi32>
    %c1_i32_15 = arith.constant 1 : i32
    %34 = vector.broadcast %c1_i32_15 : i32 to vector<1x256xi32>
    %35 = arith.cmpi sge, %29, %34 : vector<1x256xi32>
    %c14_i32 = arith.constant 14 : i32
    %36 = vector.broadcast %c14_i32 : i32 to vector<1x256xi32>
    %37 = arith.cmpi sle, %29, %36 : vector<1x256xi32>
    %cst_16 = arith.constant 0.000000e+00 : f32
    %38 = vector.broadcast %cst_16 : f32 to vector<4x256xf32>
    %c0_17 = arith.constant 0 : index
    %c0_18 = arith.constant 0 : index
    %c0_19 = arith.constant 0 : index
    %39 = vector.load %arg5[%c0_17, %c0_18, %c0_19] : memref<9x4x4xbf16, #tpu.memory_space<vmem>>, vector<1x4x4xbf16>
    %40 = vector.shape_cast %39 : vector<1x4x4xbf16> to vector<4x4xbf16>
    %c17_i32 = arith.constant 17 : i32
    %41 = tpu.dynamic_rotate %10 by %c17_i32 dim 1 : vector<4x256xf32>, i32 -> vector<4x256xf32>
    %42 = arith.andi %31, %35 : vector<1x256xi1>
    %cst_20 = arith.constant 0.000000e+00 : f32
    %43 = vector.shape_cast %42 : vector<1x256xi1> to vector<1x256xi1>
    %44 = vector.broadcast %43 : vector<1x256xi1> to vector<4x256xi1>
    %45 = vector.broadcast %cst_20 : f32 to vector<4x256xf32>
    %46 = arith.select %44, %41, %45 : vector<4x256xi1>, vector<4x256xf32>
    %47 = arith.truncf %46 : vector<4x256xf32> to vector<4x256xbf16>
    %cst_21 = arith.constant dense<0.000000e+00> : vector<4x256xf32>
    %48 = tpu.matmul %40, %47, %cst_21 {dimension_numbers = #tpu.dot_dimension_numbers<[1], [0], [0], [1], [0, 0, 1, 1], [], []>} : vector<4x4xbf16>, vector<4x256xbf16>, vector<4x256xf32> -> vector<4x256xf32>
    %49 = arith.addf %38, %48 : vector<4x256xf32>
    %c1 = arith.constant 1 : index
    %c0_22 = arith.constant 0 : index
    %c0_23 = arith.constant 0 : index
    %50 = vector.load %arg5[%c1, %c0_22, %c0_23] : memref<9x4x4xbf16, #tpu.memory_space<vmem>>, vector<1x4x4xbf16>
    %51 = vector.shape_cast %50 : vector<1x4x4xbf16> to vector<4x4xbf16>
    %c16_i32_24 = arith.constant 16 : i32
    %52 = tpu.dynamic_rotate %10 by %c16_i32_24 dim 1 : vector<4x256xf32>, i32 -> vector<4x256xf32>
    %cst_25 = arith.constant 0.000000e+00 : f32
    %53 = vector.shape_cast %31 : vector<1x256xi1> to vector<1x256xi1>
    %54 = vector.broadcast %53 : vector<1x256xi1> to vector<4x256xi1>
    %55 = vector.broadcast %cst_25 : f32 to vector<4x256xf32>
    %56 = arith.select %54, %52, %55 : vector<4x256xi1>, vector<4x256xf32>
    %57 = arith.truncf %56 : vector<4x256xf32> to vector<4x256xbf16>
    %cst_26 = arith.constant dense<0.000000e+00> : vector<4x256xf32>
    %58 = tpu.matmul %51, %57, %cst_26 {dimension_numbers = #tpu.dot_dimension_numbers<[1], [0], [0], [1], [0, 0, 1, 1], [], []>} : vector<4x4xbf16>, vector<4x256xbf16>, vector<4x256xf32> -> vector<4x256xf32>
    %59 = arith.addf %49, %58 : vector<4x256xf32>
    %c2 = arith.constant 2 : index
    %c0_27 = arith.constant 0 : index
    %c0_28 = arith.constant 0 : index
    %60 = vector.load %arg5[%c2, %c0_27, %c0_28] : memref<9x4x4xbf16, #tpu.memory_space<vmem>>, vector<1x4x4xbf16>
    %61 = vector.shape_cast %60 : vector<1x4x4xbf16> to vector<4x4xbf16>
    %c15_i32 = arith.constant 15 : i32
    %62 = tpu.dynamic_rotate %10 by %c15_i32 dim 1 : vector<4x256xf32>, i32 -> vector<4x256xf32>
    %63 = arith.andi %31, %37 : vector<1x256xi1>
    %cst_29 = arith.constant 0.000000e+00 : f32
    %64 = vector.shape_cast %63 : vector<1x256xi1> to vector<1x256xi1>
    %65 = vector.broadcast %64 : vector<1x256xi1> to vector<4x256xi1>
    %66 = vector.broadcast %cst_29 : f32 to vector<4x256xf32>
    %67 = arith.select %65, %62, %66 : vector<4x256xi1>, vector<4x256xf32>
    %68 = arith.truncf %67 : vector<4x256xf32> to vector<4x256xbf16>
    %cst_30 = arith.constant dense<0.000000e+00> : vector<4x256xf32>
    %69 = tpu.matmul %61, %68, %cst_30 {dimension_numbers = #tpu.dot_dimension_numbers<[1], [0], [0], [1], [0, 0, 1, 1], [], []>} : vector<4x4xbf16>, vector<4x256xbf16>, vector<4x256xf32> -> vector<4x256xf32>
    %70 = arith.addf %59, %69 : vector<4x256xf32>
    %c3 = arith.constant 3 : index
    %c0_31 = arith.constant 0 : index
    %c0_32 = arith.constant 0 : index
    %71 = vector.load %arg5[%c3, %c0_31, %c0_32] : memref<9x4x4xbf16, #tpu.memory_space<vmem>>, vector<1x4x4xbf16>
    %72 = vector.shape_cast %71 : vector<1x4x4xbf16> to vector<4x4xbf16>
    %c1_i32_33 = arith.constant 1 : i32
    %73 = tpu.dynamic_rotate %10 by %c1_i32_33 dim 1 : vector<4x256xf32>, i32 -> vector<4x256xf32>
    %cst_34 = arith.constant 0.000000e+00 : f32
    %74 = vector.shape_cast %35 : vector<1x256xi1> to vector<1x256xi1>
    %75 = vector.broadcast %74 : vector<1x256xi1> to vector<4x256xi1>
    %76 = vector.broadcast %cst_34 : f32 to vector<4x256xf32>
    %77 = arith.select %75, %73, %76 : vector<4x256xi1>, vector<4x256xf32>
    %78 = arith.truncf %77 : vector<4x256xf32> to vector<4x256xbf16>
    %cst_35 = arith.constant dense<0.000000e+00> : vector<4x256xf32>
    %79 = tpu.matmul %72, %78, %cst_35 {dimension_numbers = #tpu.dot_dimension_numbers<[1], [0], [0], [1], [0, 0, 1, 1], [], []>} : vector<4x4xbf16>, vector<4x256xbf16>, vector<4x256xf32> -> vector<4x256xf32>
    %80 = arith.addf %70, %79 : vector<4x256xf32>
    %c4 = arith.constant 4 : index
    %c0_36 = arith.constant 0 : index
    %c0_37 = arith.constant 0 : index
    %81 = vector.load %arg5[%c4, %c0_36, %c0_37] : memref<9x4x4xbf16, #tpu.memory_space<vmem>>, vector<1x4x4xbf16>
    %82 = vector.shape_cast %81 : vector<1x4x4xbf16> to vector<4x4xbf16>
    %83 = arith.truncf %10 : vector<4x256xf32> to vector<4x256xbf16>
    %cst_38 = arith.constant dense<0.000000e+00> : vector<4x256xf32>
    %84 = tpu.matmul %82, %83, %cst_38 {dimension_numbers = #tpu.dot_dimension_numbers<[1], [0], [0], [1], [0, 0, 1, 1], [], []>} : vector<4x4xbf16>, vector<4x256xbf16>, vector<4x256xf32> -> vector<4x256xf32>
    %85 = arith.addf %80, %84 : vector<4x256xf32>
    %c5 = arith.constant 5 : index
    %c0_39 = arith.constant 0 : index
    %c0_40 = arith.constant 0 : index
    %86 = vector.load %arg5[%c5, %c0_39, %c0_40] : memref<9x4x4xbf16, #tpu.memory_space<vmem>>, vector<1x4x4xbf16>
    %87 = vector.shape_cast %86 : vector<1x4x4xbf16> to vector<4x4xbf16>
    %c255_i32 = arith.constant 255 : i32
    %88 = tpu.dynamic_rotate %10 by %c255_i32 dim 1 : vector<4x256xf32>, i32 -> vector<4x256xf32>
    %cst_41 = arith.constant 0.000000e+00 : f32
    %89 = vector.shape_cast %37 : vector<1x256xi1> to vector<1x256xi1>
    %90 = vector.broadcast %89 : vector<1x256xi1> to vector<4x256xi1>
    %91 = vector.broadcast %cst_41 : f32 to vector<4x256xf32>
    %92 = arith.select %90, %88, %91 : vector<4x256xi1>, vector<4x256xf32>
    %93 = arith.truncf %92 : vector<4x256xf32> to vector<4x256xbf16>
    %cst_42 = arith.constant dense<0.000000e+00> : vector<4x256xf32>
    %94 = tpu.matmul %87, %93, %cst_42 {dimension_numbers = #tpu.dot_dimension_numbers<[1], [0], [0], [1], [0, 0, 1, 1], [], []>} : vector<4x4xbf16>, vector<4x256xbf16>, vector<4x256xf32> -> vector<4x256xf32>
    %95 = arith.addf %85, %94 : vector<4x256xf32>
    %c6 = arith.constant 6 : index
    %c0_43 = arith.constant 0 : index
    %c0_44 = arith.constant 0 : index
    %96 = vector.load %arg5[%c6, %c0_43, %c0_44] : memref<9x4x4xbf16, #tpu.memory_space<vmem>>, vector<1x4x4xbf16>
    %97 = vector.shape_cast %96 : vector<1x4x4xbf16> to vector<4x4xbf16>
    %c241_i32 = arith.constant 241 : i32
    %98 = tpu.dynamic_rotate %10 by %c241_i32 dim 1 : vector<4x256xf32>, i32 -> vector<4x256xf32>
    %99 = arith.andi %33, %35 : vector<1x256xi1>
    %cst_45 = arith.constant 0.000000e+00 : f32
    %100 = vector.shape_cast %99 : vector<1x256xi1> to vector<1x256xi1>
    %101 = vector.broadcast %100 : vector<1x256xi1> to vector<4x256xi1>
    %102 = vector.broadcast %cst_45 : f32 to vector<4x256xf32>
    %103 = arith.select %101, %98, %102 : vector<4x256xi1>, vector<4x256xf32>
    %104 = arith.truncf %103 : vector<4x256xf32> to vector<4x256xbf16>
    %cst_46 = arith.constant dense<0.000000e+00> : vector<4x256xf32>
    %105 = tpu.matmul %97, %104, %cst_46 {dimension_numbers = #tpu.dot_dimension_numbers<[1], [0], [0], [1], [0, 0, 1, 1], [], []>} : vector<4x4xbf16>, vector<4x256xbf16>, vector<4x256xf32> -> vector<4x256xf32>
    %106 = arith.addf %95, %105 : vector<4x256xf32>
    %c7 = arith.constant 7 : index
    %c0_47 = arith.constant 0 : index
    %c0_48 = arith.constant 0 : index
    %107 = vector.load %arg5[%c7, %c0_47, %c0_48] : memref<9x4x4xbf16, #tpu.memory_space<vmem>>, vector<1x4x4xbf16>
    %108 = vector.shape_cast %107 : vector<1x4x4xbf16> to vector<4x4xbf16>
    %c240_i32_49 = arith.constant 240 : i32
    %109 = tpu.dynamic_rotate %10 by %c240_i32_49 dim 1 : vector<4x256xf32>, i32 -> vector<4x256xf32>
    %cst_50 = arith.constant 0.000000e+00 : f32
    %110 = vector.shape_cast %33 : vector<1x256xi1> to vector<1x256xi1>
    %111 = vector.broadcast %110 : vector<1x256xi1> to vector<4x256xi1>
    %112 = vector.broadcast %cst_50 : f32 to vector<4x256xf32>
    %113 = arith.select %111, %109, %112 : vector<4x256xi1>, vector<4x256xf32>
    %114 = arith.truncf %113 : vector<4x256xf32> to vector<4x256xbf16>
    %cst_51 = arith.constant dense<0.000000e+00> : vector<4x256xf32>
    %115 = tpu.matmul %108, %114, %cst_51 {dimension_numbers = #tpu.dot_dimension_numbers<[1], [0], [0], [1], [0, 0, 1, 1], [], []>} : vector<4x4xbf16>, vector<4x256xbf16>, vector<4x256xf32> -> vector<4x256xf32>
    %116 = arith.addf %106, %115 : vector<4x256xf32>
    %c8 = arith.constant 8 : index
    %c0_52 = arith.constant 0 : index
    %c0_53 = arith.constant 0 : index
    %117 = vector.load %arg5[%c8, %c0_52, %c0_53] : memref<9x4x4xbf16, #tpu.memory_space<vmem>>, vector<1x4x4xbf16>
    %118 = vector.shape_cast %117 : vector<1x4x4xbf16> to vector<4x4xbf16>
    %c239_i32 = arith.constant 239 : i32
    %119 = tpu.dynamic_rotate %10 by %c239_i32 dim 1 : vector<4x256xf32>, i32 -> vector<4x256xf32>
    %120 = arith.andi %33, %37 : vector<1x256xi1>
    %cst_54 = arith.constant 0.000000e+00 : f32
    %121 = vector.shape_cast %120 : vector<1x256xi1> to vector<1x256xi1>
    %122 = vector.broadcast %121 : vector<1x256xi1> to vector<4x256xi1>
    %123 = vector.broadcast %cst_54 : f32 to vector<4x256xf32>
    %124 = arith.select %122, %119, %123 : vector<4x256xi1>, vector<4x256xf32>
    %125 = arith.truncf %124 : vector<4x256xf32> to vector<4x256xbf16>
    %cst_55 = arith.constant dense<0.000000e+00> : vector<4x256xf32>
    %126 = tpu.matmul %118, %125, %cst_55 {dimension_numbers = #tpu.dot_dimension_numbers<[1], [0], [0], [1], [0, 0, 1, 1], [], []>} : vector<4x4xbf16>, vector<4x256xbf16>, vector<4x256xf32> -> vector<4x256xf32>
    %127 = arith.addf %116, %126 : vector<4x256xf32>
    %c0_56 = arith.constant 0 : index
    %c0_57 = arith.constant 0 : index
    %c0_58 = arith.constant 0 : index
    %128 = vector.load %arg6[%c0_56, %c0_57, %c0_58] : memref<9x4x4xbf16, #tpu.memory_space<vmem>>, vector<1x4x4xbf16>
    %129 = vector.shape_cast %128 : vector<1x4x4xbf16> to vector<4x4xbf16>
    %c17_i32_59 = arith.constant 17 : i32
    %130 = tpu.dynamic_rotate %12 by %c17_i32_59 dim 1 : vector<4x256xf32>, i32 -> vector<4x256xf32>
    %131 = arith.andi %31, %35 : vector<1x256xi1>
    %cst_60 = arith.constant 0.000000e+00 : f32
    %132 = vector.shape_cast %131 : vector<1x256xi1> to vector<1x256xi1>
    %133 = vector.broadcast %132 : vector<1x256xi1> to vector<4x256xi1>
    %134 = vector.broadcast %cst_60 : f32 to vector<4x256xf32>
    %135 = arith.select %133, %130, %134 : vector<4x256xi1>, vector<4x256xf32>
    %136 = arith.truncf %135 : vector<4x256xf32> to vector<4x256xbf16>
    %cst_61 = arith.constant dense<0.000000e+00> : vector<4x256xf32>
    %137 = tpu.matmul %129, %136, %cst_61 {dimension_numbers = #tpu.dot_dimension_numbers<[1], [0], [0], [1], [0, 0, 1, 1], [], []>} : vector<4x4xbf16>, vector<4x256xbf16>, vector<4x256xf32> -> vector<4x256xf32>
    %138 = arith.addf %127, %137 : vector<4x256xf32>
    %c1_62 = arith.constant 1 : index
    %c0_63 = arith.constant 0 : index
    %c0_64 = arith.constant 0 : index
    %139 = vector.load %arg6[%c1_62, %c0_63, %c0_64] : memref<9x4x4xbf16, #tpu.memory_space<vmem>>, vector<1x4x4xbf16>
    %140 = vector.shape_cast %139 : vector<1x4x4xbf16> to vector<4x4xbf16>
    %c16_i32_65 = arith.constant 16 : i32
    %141 = tpu.dynamic_rotate %12 by %c16_i32_65 dim 1 : vector<4x256xf32>, i32 -> vector<4x256xf32>
    %cst_66 = arith.constant 0.000000e+00 : f32
    %142 = vector.shape_cast %31 : vector<1x256xi1> to vector<1x256xi1>
    %143 = vector.broadcast %142 : vector<1x256xi1> to vector<4x256xi1>
    %144 = vector.broadcast %cst_66 : f32 to vector<4x256xf32>
    %145 = arith.select %143, %141, %144 : vector<4x256xi1>, vector<4x256xf32>
    %146 = arith.truncf %145 : vector<4x256xf32> to vector<4x256xbf16>
    %cst_67 = arith.constant dense<0.000000e+00> : vector<4x256xf32>
    %147 = tpu.matmul %140, %146, %cst_67 {dimension_numbers = #tpu.dot_dimension_numbers<[1], [0], [0], [1], [0, 0, 1, 1], [], []>} : vector<4x4xbf16>, vector<4x256xbf16>, vector<4x256xf32> -> vector<4x256xf32>
    %148 = arith.addf %138, %147 : vector<4x256xf32>
    %c2_68 = arith.constant 2 : index
    %c0_69 = arith.constant 0 : index
    %c0_70 = arith.constant 0 : index
    %149 = vector.load %arg6[%c2_68, %c0_69, %c0_70] : memref<9x4x4xbf16, #tpu.memory_space<vmem>>, vector<1x4x4xbf16>
    %150 = vector.shape_cast %149 : vector<1x4x4xbf16> to vector<4x4xbf16>
    %c15_i32_71 = arith.constant 15 : i32
    %151 = tpu.dynamic_rotate %12 by %c15_i32_71 dim 1 : vector<4x256xf32>, i32 -> vector<4x256xf32>
    %152 = arith.andi %31, %37 : vector<1x256xi1>
    %cst_72 = arith.constant 0.000000e+00 : f32
    %153 = vector.shape_cast %152 : vector<1x256xi1> to vector<1x256xi1>
    %154 = vector.broadcast %153 : vector<1x256xi1> to vector<4x256xi1>
    %155 = vector.broadcast %cst_72 : f32 to vector<4x256xf32>
    %156 = arith.select %154, %151, %155 : vector<4x256xi1>, vector<4x256xf32>
    %157 = arith.truncf %156 : vector<4x256xf32> to vector<4x256xbf16>
    %cst_73 = arith.constant dense<0.000000e+00> : vector<4x256xf32>
    %158 = tpu.matmul %150, %157, %cst_73 {dimension_numbers = #tpu.dot_dimension_numbers<[1], [0], [0], [1], [0, 0, 1, 1], [], []>} : vector<4x4xbf16>, vector<4x256xbf16>, vector<4x256xf32> -> vector<4x256xf32>
    %159 = arith.addf %148, %158 : vector<4x256xf32>
    %c3_74 = arith.constant 3 : index
    %c0_75 = arith.constant 0 : index
    %c0_76 = arith.constant 0 : index
    %160 = vector.load %arg6[%c3_74, %c0_75, %c0_76] : memref<9x4x4xbf16, #tpu.memory_space<vmem>>, vector<1x4x4xbf16>
    %161 = vector.shape_cast %160 : vector<1x4x4xbf16> to vector<4x4xbf16>
    %c1_i32_77 = arith.constant 1 : i32
    %162 = tpu.dynamic_rotate %12 by %c1_i32_77 dim 1 : vector<4x256xf32>, i32 -> vector<4x256xf32>
    %cst_78 = arith.constant 0.000000e+00 : f32
    %163 = vector.shape_cast %35 : vector<1x256xi1> to vector<1x256xi1>
    %164 = vector.broadcast %163 : vector<1x256xi1> to vector<4x256xi1>
    %165 = vector.broadcast %cst_78 : f32 to vector<4x256xf32>
    %166 = arith.select %164, %162, %165 : vector<4x256xi1>, vector<4x256xf32>
    %167 = arith.truncf %166 : vector<4x256xf32> to vector<4x256xbf16>
    %cst_79 = arith.constant dense<0.000000e+00> : vector<4x256xf32>
    %168 = tpu.matmul %161, %167, %cst_79 {dimension_numbers = #tpu.dot_dimension_numbers<[1], [0], [0], [1], [0, 0, 1, 1], [], []>} : vector<4x4xbf16>, vector<4x256xbf16>, vector<4x256xf32> -> vector<4x256xf32>
    %169 = arith.addf %159, %168 : vector<4x256xf32>
    %c4_80 = arith.constant 4 : index
    %c0_81 = arith.constant 0 : index
    %c0_82 = arith.constant 0 : index
    %170 = vector.load %arg6[%c4_80, %c0_81, %c0_82] : memref<9x4x4xbf16, #tpu.memory_space<vmem>>, vector<1x4x4xbf16>
    %171 = vector.shape_cast %170 : vector<1x4x4xbf16> to vector<4x4xbf16>
    %172 = arith.truncf %12 : vector<4x256xf32> to vector<4x256xbf16>
    %cst_83 = arith.constant dense<0.000000e+00> : vector<4x256xf32>
    %173 = tpu.matmul %171, %172, %cst_83 {dimension_numbers = #tpu.dot_dimension_numbers<[1], [0], [0], [1], [0, 0, 1, 1], [], []>} : vector<4x4xbf16>, vector<4x256xbf16>, vector<4x256xf32> -> vector<4x256xf32>
    %174 = arith.addf %169, %173 : vector<4x256xf32>
    %c5_84 = arith.constant 5 : index
    %c0_85 = arith.constant 0 : index
    %c0_86 = arith.constant 0 : index
    %175 = vector.load %arg6[%c5_84, %c0_85, %c0_86] : memref<9x4x4xbf16, #tpu.memory_space<vmem>>, vector<1x4x4xbf16>
    %176 = vector.shape_cast %175 : vector<1x4x4xbf16> to vector<4x4xbf16>
    %c255_i32_87 = arith.constant 255 : i32
    %177 = tpu.dynamic_rotate %12 by %c255_i32_87 dim 1 : vector<4x256xf32>, i32 -> vector<4x256xf32>
    %cst_88 = arith.constant 0.000000e+00 : f32
    %178 = vector.shape_cast %37 : vector<1x256xi1> to vector<1x256xi1>
    %179 = vector.broadcast %178 : vector<1x256xi1> to vector<4x256xi1>
    %180 = vector.broadcast %cst_88 : f32 to vector<4x256xf32>
    %181 = arith.select %179, %177, %180 : vector<4x256xi1>, vector<4x256xf32>
    %182 = arith.truncf %181 : vector<4x256xf32> to vector<4x256xbf16>
    %cst_89 = arith.constant dense<0.000000e+00> : vector<4x256xf32>
    %183 = tpu.matmul %176, %182, %cst_89 {dimension_numbers = #tpu.dot_dimension_numbers<[1], [0], [0], [1], [0, 0, 1, 1], [], []>} : vector<4x4xbf16>, vector<4x256xbf16>, vector<4x256xf32> -> vector<4x256xf32>
    %184 = arith.addf %174, %183 : vector<4x256xf32>
    %c6_90 = arith.constant 6 : index
    %c0_91 = arith.constant 0 : index
    %c0_92 = arith.constant 0 : index
    %185 = vector.load %arg6[%c6_90, %c0_91, %c0_92] : memref<9x4x4xbf16, #tpu.memory_space<vmem>>, vector<1x4x4xbf16>
    %186 = vector.shape_cast %185 : vector<1x4x4xbf16> to vector<4x4xbf16>
    %c241_i32_93 = arith.constant 241 : i32
    %187 = tpu.dynamic_rotate %12 by %c241_i32_93 dim 1 : vector<4x256xf32>, i32 -> vector<4x256xf32>
    %188 = arith.andi %33, %35 : vector<1x256xi1>
    %cst_94 = arith.constant 0.000000e+00 : f32
    %189 = vector.shape_cast %188 : vector<1x256xi1> to vector<1x256xi1>
    %190 = vector.broadcast %189 : vector<1x256xi1> to vector<4x256xi1>
    %191 = vector.broadcast %cst_94 : f32 to vector<4x256xf32>
    %192 = arith.select %190, %187, %191 : vector<4x256xi1>, vector<4x256xf32>
    %193 = arith.truncf %192 : vector<4x256xf32> to vector<4x256xbf16>
    %cst_95 = arith.constant dense<0.000000e+00> : vector<4x256xf32>
    %194 = tpu.matmul %186, %193, %cst_95 {dimension_numbers = #tpu.dot_dimension_numbers<[1], [0], [0], [1], [0, 0, 1, 1], [], []>} : vector<4x4xbf16>, vector<4x256xbf16>, vector<4x256xf32> -> vector<4x256xf32>
    %195 = arith.addf %184, %194 : vector<4x256xf32>
    %c7_96 = arith.constant 7 : index
    %c0_97 = arith.constant 0 : index
    %c0_98 = arith.constant 0 : index
    %196 = vector.load %arg6[%c7_96, %c0_97, %c0_98] : memref<9x4x4xbf16, #tpu.memory_space<vmem>>, vector<1x4x4xbf16>
    %197 = vector.shape_cast %196 : vector<1x4x4xbf16> to vector<4x4xbf16>
    %c240_i32_99 = arith.constant 240 : i32
    %198 = tpu.dynamic_rotate %12 by %c240_i32_99 dim 1 : vector<4x256xf32>, i32 -> vector<4x256xf32>
    %cst_100 = arith.constant 0.000000e+00 : f32
    %199 = vector.shape_cast %33 : vector<1x256xi1> to vector<1x256xi1>
    %200 = vector.broadcast %199 : vector<1x256xi1> to vector<4x256xi1>
    %201 = vector.broadcast %cst_100 : f32 to vector<4x256xf32>
    %202 = arith.select %200, %198, %201 : vector<4x256xi1>, vector<4x256xf32>
    %203 = arith.truncf %202 : vector<4x256xf32> to vector<4x256xbf16>
    %cst_101 = arith.constant dense<0.000000e+00> : vector<4x256xf32>
    %204 = tpu.matmul %197, %203, %cst_101 {dimension_numbers = #tpu.dot_dimension_numbers<[1], [0], [0], [1], [0, 0, 1, 1], [], []>} : vector<4x4xbf16>, vector<4x256xbf16>, vector<4x256xf32> -> vector<4x256xf32>
    %205 = arith.addf %195, %204 : vector<4x256xf32>
    %c8_102 = arith.constant 8 : index
    %c0_103 = arith.constant 0 : index
    %c0_104 = arith.constant 0 : index
    %206 = vector.load %arg6[%c8_102, %c0_103, %c0_104] : memref<9x4x4xbf16, #tpu.memory_space<vmem>>, vector<1x4x4xbf16>
    %207 = vector.shape_cast %206 : vector<1x4x4xbf16> to vector<4x4xbf16>
    %c239_i32_105 = arith.constant 239 : i32
    %208 = tpu.dynamic_rotate %12 by %c239_i32_105 dim 1 : vector<4x256xf32>, i32 -> vector<4x256xf32>
    %209 = arith.andi %33, %37 : vector<1x256xi1>
    %cst_106 = arith.constant 0.000000e+00 : f32
    %210 = vector.shape_cast %209 : vector<1x256xi1> to vector<1x256xi1>
    %211 = vector.broadcast %210 : vector<1x256xi1> to vector<4x256xi1>
    %212 = vector.broadcast %cst_106 : f32 to vector<4x256xf32>
    %213 = arith.select %211, %208, %212 : vector<4x256xi1>, vector<4x256xf32>
    %214 = arith.truncf %213 : vector<4x256xf32> to vector<4x256xbf16>
    %cst_107 = arith.constant dense<0.000000e+00> : vector<4x256xf32>
    %215 = tpu.matmul %207, %214, %cst_107 {dimension_numbers = #tpu.dot_dimension_numbers<[1], [0], [0], [1], [0, 0, 1, 1], [], []>} : vector<4x4xbf16>, vector<4x256xbf16>, vector<4x256xf32> -> vector<4x256xf32>
    %216 = arith.addf %205, %215 : vector<4x256xf32>
    %c0_108 = arith.constant 0 : index
    %c0_109 = arith.constant 0 : index
    %217 = vector.load %arg8[%c0_108, %c0_109] : memref<4x1xf32, #tpu.memory_space<vmem>>, vector<4x1xf32>
    %218 = vector.broadcast %217 : vector<4x1xf32> to vector<4x256xf32>
    %219 = arith.addf %216, %218 : vector<4x256xf32>
    %cst_110 = arith.constant 0.000000e+00 : f32
    %220 = vector.broadcast %cst_110 : f32 to vector<4x256xf32>
    %221 = arith.maximumf %219, %220 : vector<4x256xf32>
    %cst_111 = arith.constant 0.000000e+00 : f32
    %222 = vector.broadcast %cst_111 : f32 to vector<4x256xf32>
    %c0_112 = arith.constant 0 : index
    %c0_113 = arith.constant 0 : index
    %c0_114 = arith.constant 0 : index
    %223 = vector.load %arg7[%c0_112, %c0_113, %c0_114] : memref<9x4x4xbf16, #tpu.memory_space<vmem>>, vector<1x4x4xbf16>
    %224 = vector.shape_cast %223 : vector<1x4x4xbf16> to vector<4x4xbf16>
    %c17_i32_115 = arith.constant 17 : i32
    %225 = tpu.dynamic_rotate %221 by %c17_i32_115 dim 1 : vector<4x256xf32>, i32 -> vector<4x256xf32>
    %226 = arith.andi %31, %35 : vector<1x256xi1>
    %cst_116 = arith.constant 0.000000e+00 : f32
    %227 = vector.shape_cast %226 : vector<1x256xi1> to vector<1x256xi1>
    %228 = vector.broadcast %227 : vector<1x256xi1> to vector<4x256xi1>
    %229 = vector.broadcast %cst_116 : f32 to vector<4x256xf32>
    %230 = arith.select %228, %225, %229 : vector<4x256xi1>, vector<4x256xf32>
    %231 = arith.truncf %230 : vector<4x256xf32> to vector<4x256xbf16>
    %cst_117 = arith.constant dense<0.000000e+00> : vector<4x256xf32>
    %232 = tpu.matmul %224, %231, %cst_117 {dimension_numbers = #tpu.dot_dimension_numbers<[1], [0], [0], [1], [0, 0, 1, 1], [], []>} : vector<4x4xbf16>, vector<4x256xbf16>, vector<4x256xf32> -> vector<4x256xf32>
    %233 = arith.addf %222, %232 : vector<4x256xf32>
    %c1_118 = arith.constant 1 : index
    %c0_119 = arith.constant 0 : index
    %c0_120 = arith.constant 0 : index
    %234 = vector.load %arg7[%c1_118, %c0_119, %c0_120] : memref<9x4x4xbf16, #tpu.memory_space<vmem>>, vector<1x4x4xbf16>
    %235 = vector.shape_cast %234 : vector<1x4x4xbf16> to vector<4x4xbf16>
    %c16_i32_121 = arith.constant 16 : i32
    %236 = tpu.dynamic_rotate %221 by %c16_i32_121 dim 1 : vector<4x256xf32>, i32 -> vector<4x256xf32>
    %cst_122 = arith.constant 0.000000e+00 : f32
    %237 = vector.shape_cast %31 : vector<1x256xi1> to vector<1x256xi1>
    %238 = vector.broadcast %237 : vector<1x256xi1> to vector<4x256xi1>
    %239 = vector.broadcast %cst_122 : f32 to vector<4x256xf32>
    %240 = arith.select %238, %236, %239 : vector<4x256xi1>, vector<4x256xf32>
    %241 = arith.truncf %240 : vector<4x256xf32> to vector<4x256xbf16>
    %cst_123 = arith.constant dense<0.000000e+00> : vector<4x256xf32>
    %242 = tpu.matmul %235, %241, %cst_123 {dimension_numbers = #tpu.dot_dimension_numbers<[1], [0], [0], [1], [0, 0, 1, 1], [], []>} : vector<4x4xbf16>, vector<4x256xbf16>, vector<4x256xf32> -> vector<4x256xf32>
    %243 = arith.addf %233, %242 : vector<4x256xf32>
    %c2_124 = arith.constant 2 : index
    %c0_125 = arith.constant 0 : index
    %c0_126 = arith.constant 0 : index
    %244 = vector.load %arg7[%c2_124, %c0_125, %c0_126] : memref<9x4x4xbf16, #tpu.memory_space<vmem>>, vector<1x4x4xbf16>
    %245 = vector.shape_cast %244 : vector<1x4x4xbf16> to vector<4x4xbf16>
    %c15_i32_127 = arith.constant 15 : i32
    %246 = tpu.dynamic_rotate %221 by %c15_i32_127 dim 1 : vector<4x256xf32>, i32 -> vector<4x256xf32>
    %247 = arith.andi %31, %37 : vector<1x256xi1>
    %cst_128 = arith.constant 0.000000e+00 : f32
    %248 = vector.shape_cast %247 : vector<1x256xi1> to vector<1x256xi1>
    %249 = vector.broadcast %248 : vector<1x256xi1> to vector<4x256xi1>
    %250 = vector.broadcast %cst_128 : f32 to vector<4x256xf32>
    %251 = arith.select %249, %246, %250 : vector<4x256xi1>, vector<4x256xf32>
    %252 = arith.truncf %251 : vector<4x256xf32> to vector<4x256xbf16>
    %cst_129 = arith.constant dense<0.000000e+00> : vector<4x256xf32>
    %253 = tpu.matmul %245, %252, %cst_129 {dimension_numbers = #tpu.dot_dimension_numbers<[1], [0], [0], [1], [0, 0, 1, 1], [], []>} : vector<4x4xbf16>, vector<4x256xbf16>, vector<4x256xf32> -> vector<4x256xf32>
    %254 = arith.addf %243, %253 : vector<4x256xf32>
    %c3_130 = arith.constant 3 : index
    %c0_131 = arith.constant 0 : index
    %c0_132 = arith.constant 0 : index
    %255 = vector.load %arg7[%c3_130, %c0_131, %c0_132] : memref<9x4x4xbf16, #tpu.memory_space<vmem>>, vector<1x4x4xbf16>
    %256 = vector.shape_cast %255 : vector<1x4x4xbf16> to vector<4x4xbf16>
    %c1_i32_133 = arith.constant 1 : i32
    %257 = tpu.dynamic_rotate %221 by %c1_i32_133 dim 1 : vector<4x256xf32>, i32 -> vector<4x256xf32>
    %cst_134 = arith.constant 0.000000e+00 : f32
    %258 = vector.shape_cast %35 : vector<1x256xi1> to vector<1x256xi1>
    %259 = vector.broadcast %258 : vector<1x256xi1> to vector<4x256xi1>
    %260 = vector.broadcast %cst_134 : f32 to vector<4x256xf32>
    %261 = arith.select %259, %257, %260 : vector<4x256xi1>, vector<4x256xf32>
    %262 = arith.truncf %261 : vector<4x256xf32> to vector<4x256xbf16>
    %cst_135 = arith.constant dense<0.000000e+00> : vector<4x256xf32>
    %263 = tpu.matmul %256, %262, %cst_135 {dimension_numbers = #tpu.dot_dimension_numbers<[1], [0], [0], [1], [0, 0, 1, 1], [], []>} : vector<4x4xbf16>, vector<4x256xbf16>, vector<4x256xf32> -> vector<4x256xf32>
    %264 = arith.addf %254, %263 : vector<4x256xf32>
    %c4_136 = arith.constant 4 : index
    %c0_137 = arith.constant 0 : index
    %c0_138 = arith.constant 0 : index
    %265 = vector.load %arg7[%c4_136, %c0_137, %c0_138] : memref<9x4x4xbf16, #tpu.memory_space<vmem>>, vector<1x4x4xbf16>
    %266 = vector.shape_cast %265 : vector<1x4x4xbf16> to vector<4x4xbf16>
    %267 = arith.truncf %221 : vector<4x256xf32> to vector<4x256xbf16>
    %cst_139 = arith.constant dense<0.000000e+00> : vector<4x256xf32>
    %268 = tpu.matmul %266, %267, %cst_139 {dimension_numbers = #tpu.dot_dimension_numbers<[1], [0], [0], [1], [0, 0, 1, 1], [], []>} : vector<4x4xbf16>, vector<4x256xbf16>, vector<4x256xf32> -> vector<4x256xf32>
    %269 = arith.addf %264, %268 : vector<4x256xf32>
    %c5_140 = arith.constant 5 : index
    %c0_141 = arith.constant 0 : index
    %c0_142 = arith.constant 0 : index
    %270 = vector.load %arg7[%c5_140, %c0_141, %c0_142] : memref<9x4x4xbf16, #tpu.memory_space<vmem>>, vector<1x4x4xbf16>
    %271 = vector.shape_cast %270 : vector<1x4x4xbf16> to vector<4x4xbf16>
    %c255_i32_143 = arith.constant 255 : i32
    %272 = tpu.dynamic_rotate %221 by %c255_i32_143 dim 1 : vector<4x256xf32>, i32 -> vector<4x256xf32>
    %cst_144 = arith.constant 0.000000e+00 : f32
    %273 = vector.shape_cast %37 : vector<1x256xi1> to vector<1x256xi1>
    %274 = vector.broadcast %273 : vector<1x256xi1> to vector<4x256xi1>
    %275 = vector.broadcast %cst_144 : f32 to vector<4x256xf32>
    %276 = arith.select %274, %272, %275 : vector<4x256xi1>, vector<4x256xf32>
    %277 = arith.truncf %276 : vector<4x256xf32> to vector<4x256xbf16>
    %cst_145 = arith.constant dense<0.000000e+00> : vector<4x256xf32>
    %278 = tpu.matmul %271, %277, %cst_145 {dimension_numbers = #tpu.dot_dimension_numbers<[1], [0], [0], [1], [0, 0, 1, 1], [], []>} : vector<4x4xbf16>, vector<4x256xbf16>, vector<4x256xf32> -> vector<4x256xf32>
    %279 = arith.addf %269, %278 : vector<4x256xf32>
    %c6_146 = arith.constant 6 : index
    %c0_147 = arith.constant 0 : index
    %c0_148 = arith.constant 0 : index
    %280 = vector.load %arg7[%c6_146, %c0_147, %c0_148] : memref<9x4x4xbf16, #tpu.memory_space<vmem>>, vector<1x4x4xbf16>
    %281 = vector.shape_cast %280 : vector<1x4x4xbf16> to vector<4x4xbf16>
    %c241_i32_149 = arith.constant 241 : i32
    %282 = tpu.dynamic_rotate %221 by %c241_i32_149 dim 1 : vector<4x256xf32>, i32 -> vector<4x256xf32>
    %283 = arith.andi %33, %35 : vector<1x256xi1>
    %cst_150 = arith.constant 0.000000e+00 : f32
    %284 = vector.shape_cast %283 : vector<1x256xi1> to vector<1x256xi1>
    %285 = vector.broadcast %284 : vector<1x256xi1> to vector<4x256xi1>
    %286 = vector.broadcast %cst_150 : f32 to vector<4x256xf32>
    %287 = arith.select %285, %282, %286 : vector<4x256xi1>, vector<4x256xf32>
    %288 = arith.truncf %287 : vector<4x256xf32> to vector<4x256xbf16>
    %cst_151 = arith.constant dense<0.000000e+00> : vector<4x256xf32>
    %289 = tpu.matmul %281, %288, %cst_151 {dimension_numbers = #tpu.dot_dimension_numbers<[1], [0], [0], [1], [0, 0, 1, 1], [], []>} : vector<4x4xbf16>, vector<4x256xbf16>, vector<4x256xf32> -> vector<4x256xf32>
    %290 = arith.addf %279, %289 : vector<4x256xf32>
    %c7_152 = arith.constant 7 : index
    %c0_153 = arith.constant 0 : index
    %c0_154 = arith.constant 0 : index
    %291 = vector.load %arg7[%c7_152, %c0_153, %c0_154] : memref<9x4x4xbf16, #tpu.memory_space<vmem>>, vector<1x4x4xbf16>
    %292 = vector.shape_cast %291 : vector<1x4x4xbf16> to vector<4x4xbf16>
    %c240_i32_155 = arith.constant 240 : i32
    %293 = tpu.dynamic_rotate %221 by %c240_i32_155 dim 1 : vector<4x256xf32>, i32 -> vector<4x256xf32>
    %cst_156 = arith.constant 0.000000e+00 : f32
    %294 = vector.shape_cast %33 : vector<1x256xi1> to vector<1x256xi1>
    %295 = vector.broadcast %294 : vector<1x256xi1> to vector<4x256xi1>
    %296 = vector.broadcast %cst_156 : f32 to vector<4x256xf32>
    %297 = arith.select %295, %293, %296 : vector<4x256xi1>, vector<4x256xf32>
    %298 = arith.truncf %297 : vector<4x256xf32> to vector<4x256xbf16>
    %cst_157 = arith.constant dense<0.000000e+00> : vector<4x256xf32>
    %299 = tpu.matmul %292, %298, %cst_157 {dimension_numbers = #tpu.dot_dimension_numbers<[1], [0], [0], [1], [0, 0, 1, 1], [], []>} : vector<4x4xbf16>, vector<4x256xbf16>, vector<4x256xf32> -> vector<4x256xf32>
    %300 = arith.addf %290, %299 : vector<4x256xf32>
    %c8_158 = arith.constant 8 : index
    %c0_159 = arith.constant 0 : index
    %c0_160 = arith.constant 0 : index
    %301 = vector.load %arg7[%c8_158, %c0_159, %c0_160] : memref<9x4x4xbf16, #tpu.memory_space<vmem>>, vector<1x4x4xbf16>
    %302 = vector.shape_cast %301 : vector<1x4x4xbf16> to vector<4x4xbf16>
    %c239_i32_161 = arith.constant 239 : i32
    %303 = tpu.dynamic_rotate %221 by %c239_i32_161 dim 1 : vector<4x256xf32>, i32 -> vector<4x256xf32>
    %304 = arith.andi %33, %37 : vector<1x256xi1>
    %cst_162 = arith.constant 0.000000e+00 : f32
    %305 = vector.shape_cast %304 : vector<1x256xi1> to vector<1x256xi1>
    %306 = vector.broadcast %305 : vector<1x256xi1> to vector<4x256xi1>
    %307 = vector.broadcast %cst_162 : f32 to vector<4x256xf32>
    %308 = arith.select %306, %303, %307 : vector<4x256xi1>, vector<4x256xf32>
    %309 = arith.truncf %308 : vector<4x256xf32> to vector<4x256xbf16>
    %cst_163 = arith.constant dense<0.000000e+00> : vector<4x256xf32>
    %310 = tpu.matmul %302, %309, %cst_163 {dimension_numbers = #tpu.dot_dimension_numbers<[1], [0], [0], [1], [0, 0, 1, 1], [], []>} : vector<4x4xbf16>, vector<4x256xbf16>, vector<4x256xf32> -> vector<4x256xf32>
    %311 = arith.addf %300, %310 : vector<4x256xf32>
    %c0_164 = arith.constant 0 : index
    %c0_165 = arith.constant 0 : index
    %312 = vector.load %arg9[%c0_164, %c0_165] : memref<4x1xf32, #tpu.memory_space<vmem>>, vector<4x1xf32>
    %313 = vector.broadcast %312 : vector<4x1xf32> to vector<4x256xf32>
    %314 = arith.addf %311, %313 : vector<4x256xf32>
    %cst_166 = arith.constant 0.000000e+00 : f32
    %315 = vector.broadcast %cst_166 : f32 to vector<4x256xf32>
    %316 = arith.maximumf %314, %315 : vector<4x256xf32>
    %c0_167 = arith.constant 0 : index
    %c0_168 = arith.constant 0 : index
    %c0_169 = arith.constant 0 : index
    %317 = vector.load %arg10[%c0_167, %c0_168, %c0_169] : memref<1x4x256xf32, #tpu.memory_space<vmem>>, vector<1x4x256xf32>
    %318 = vector.shape_cast %317 : vector<1x4x256xf32> to vector<4x256xf32>
    %319 = vector.shape_cast %316 : vector<4x256xf32> to vector<1x4x256xf32>
    tpu.vector_store %arg10[%c0_167, %c0_168, %c0_169], %319 {strides = array<i32>} : memref<1x4x256xf32, #tpu.memory_space<vmem>>, vector<1x4x256xf32>,
    return
  }
  func.func @transform_0(%arg0: i32) -> (i32, i32, i32, i32) {
    %c0_i32 = arith.constant 0 : i32
    %c0_i32_0 = arith.constant 0 : i32
    %c0_i32_1 = arith.constant 0 : i32
    %c0_i32_2 = arith.constant 0 : i32
    return %arg0, %c0_i32, %c0_i32_0, %c0_i32_1 : i32, i32, i32, i32
  }
  func.func @transform_1(%arg0: i32) -> (i32, i32, i32) {
    %c0_i32 = arith.constant 0 : i32
    %c0_i32_0 = arith.constant 0 : i32
    %c0_i32_1 = arith.constant 0 : i32
    return %arg0, %c0_i32, %c0_i32_0 : i32, i32, i32
  }
  func.func @transform_2(%arg0: i32) -> (i32, i32) {
    %c0_i32 = arith.constant 0 : i32
    %c0_i32_0 = arith.constant 0 : i32
    %c0_i32_1 = arith.constant 0 : i32
    return %c0_i32, %c0_i32_0 : i32, i32
  }
  func.func @transform_3(%arg0: i32) -> (i32, i32) {
    %c0_i32 = arith.constant 0 : i32
    %c0_i32_0 = arith.constant 0 : i32
    %c0_i32_1 = arith.constant 0 : i32
    return %c0_i32, %c0_i32_0 : i32, i32
  }
  func.func @transform_4(%arg0: i32) -> (i32, i32, i32) {
    %c0_i32 = arith.constant 0 : i32
    %c0_i32_0 = arith.constant 0 : i32
    %c0_i32_1 = arith.constant 0 : i32
    %c0_i32_2 = arith.constant 0 : i32
    return %c0_i32, %c0_i32_0, %c0_i32_1 : i32, i32, i32
  }
  func.func @transform_5(%arg0: i32) -> (i32, i32, i32) {
    %c0_i32 = arith.constant 0 : i32
    %c0_i32_0 = arith.constant 0 : i32
    %c0_i32_1 = arith.constant 0 : i32
    %c0_i32_2 = arith.constant 0 : i32
    return %c0_i32, %c0_i32_0, %c0_i32_1 : i32, i32, i32
  }
  func.func @transform_6(%arg0: i32) -> (i32, i32, i32) {
    %c0_i32 = arith.constant 0 : i32
    %c0_i32_0 = arith.constant 0 : i32
    %c0_i32_1 = arith.constant 0 : i32
    %c0_i32_2 = arith.constant 0 : i32
    return %c0_i32, %c0_i32_0, %c0_i32_1 : i32, i32, i32
  }
  func.func @transform_7(%arg0: i32) -> (i32, i32) {
    %c0_i32 = arith.constant 0 : i32
    %c0_i32_0 = arith.constant 0 : i32
    %c0_i32_1 = arith.constant 0 : i32
    return %c0_i32, %c0_i32_0 : i32, i32
  }
  func.func @transform_8(%arg0: i32) -> (i32, i32) {
    %c0_i32 = arith.constant 0 : i32
    %c0_i32_0 = arith.constant 0 : i32
    %c0_i32_1 = arith.constant 0 : i32
    return %c0_i32, %c0_i32_0 : i32, i32
  }
  func.func @transform_9(%arg0: i32) -> (i32, i32, i32) {
    %c0_i32 = arith.constant 0 : i32
    %c0_i32_0 = arith.constant 0 : i32
    %c0_i32_1 = arith.constant 0 : i32
    return %arg0, %c0_i32, %c0_i32_0 : i32, i32, i32
  }
}

</mosaic_0001>

<bundles_post_ra>
// kernel: tpu_custom_call.1
= control target key start
LH: loop header
LB: loop body
LE: loop exit
PB: predicated region body
PF: predicated region fallthrough
CT: control target
= control target key end

     0   :  { %14 = vsyncpa [#allocation3], 0  ;;  %s3992_s0 = inlined_call_operand.vmem [shape: f32[2,4,8,8], index: 0, kind: input, shape index: {}]   ;;  %s3993_s1 = inlined_call_operand.vmem [shape: f32[2,4,256], index: 1, kind: input, shape index: {}]   ;;  %s3994_s2 = inlined_call_operand.vmem [shape: f32[16,8], index: 2, kind: input, shape index: {}]   ;;  %s3995_s3 = inlined_call_operand.vmem [shape: f32[8,16], index: 3, kind: input, shape index: {}]   ;;  %s3996_s4 = inlined_call_operand.vmem [shape: bf16[9,4,4], index: 4, kind: input, shape index: {}]   ;;  %s3997_s5 = inlined_call_operand.vmem [shape: bf16[9,4,4], index: 5, kind: input, shape index: {}]   ;;  %s3998_s6 = inlined_call_operand.vmem [shape: bf16[9,4,4], index: 6, kind: input, shape index: {}]   ;;  %s3999_s7 = inlined_call_operand.vmem [shape: f32[4,1], index: 7, kind: input, shape index: {}]   ;;  %s4000_s8 = inlined_call_operand.vmem [shape: f32[4,1], index: 8, kind: input, shape index: {}]   ;;  %s4001_s9 = inlined_call_operand.hbm [shape: f32[2,4,256], index: 9, kind: output, shape index: {}]  }
   0x1   :  { %16 = vsyncpa [#allocation3 + $0x1], 0  ;;  %s3367_s30 = smov 0   ;;  %s3369_s10 = smov 0  }
   0x2   :  { %s3371_s11 = smov 0   ;;  %s3373_s12 = smov 0  }
   0x3 LB: > { %s3388_s13 = sadd.s32 4294967295, %s3297_s12   ;;  %s2869_s14 = sadd.s32 4294967294, %s3297_s12   ;;  %s3297_s12 = sphi %s3373_s12, %s4053_s12   ;;  %s3293_s11 = sphi %s3371_s11, %s4052_s11   ;;  %s3289_s10 = sphi %s3369_s10, %s4051_s10   ;;  %s3285_s30 = sphi %s3367_s30, %s4050_s30  }
   0x4   : > { %s3392_s15 = sadd.s32 1, %s3297_s12   ;;  %s228_s16 = sadd.s32 1, %s3293_s11 }
   0x5   : > { %s225_s17 = ssub.s32 %s3297_s12, %s3392_s15  ;;  %p238_p0 = scmp.ne.s32.totalorder %s3293_s11, %s3289_s10 }
   0x6   : > { %p226_p1 = scmp.eq.s32.totalorder %s225_s17, 0  ;;  %p239_p2 = scmp.eq.s32.totalorder %s3388_s13, 1 }
   0x7   : > { %p244_p3 = scmp.ne.s32.totalorder %s3289_s10, %s3285_s30  ;;  %p245_p4 = scmp.eq.s32.totalorder %s2869_s14, 1 }
   0x8   : > { %s3403_s18 = scalar_select %p226_p1, %s3293_s11, %s228_s16  }
   0x9   : > { %p3405_p5 = por %p239_p2, %p238_p0  ;;  %p3409_p6 = por %p245_p4, %p244_p3 }
   0xa   : > { %p2872_p7 = scmp.ge.s32.totalorder %s3297_s12, 1  ;;  %p300_p8 = scmp.lt.s32.totalorder %s3297_s12, 3 }
   0xc   : > { %p301_p9 = pnand %p2872_p7, %p300_p8 }
   0xd   : > { %p341_p10 = scmp.lt.s32.totalorder (!%p301_p9), %s3388_s13, 1  ;;  %s3302_s17 = smov (!%p301_p9), 64  }
   0xe   : > { %304 = sbr.rel (%p301_p9) target bundleno = 1336 (0x538), region = 56  ;;  %s3303_s21 = smov (!%p301_p9), 32  }
   0xf   : > { %s3304_s22 = smov (!%p301_p9), 48   ;;  %s3306_s25 = smov (!%p301_p9), 96  }
  0x10   : > { %s3307_s26 = smov (!%p301_p9), 80   ;;  %s3310_s29 = smov (!%p301_p9), 17  }
  0x13   : > { %v356_v0 = vld [vmem:[%s3995_s3] sm:$0xff]  ;;  %s3420_s23 = scalar_select %p341_p10, %s3388_s13, 1  ;;  %vm357_vm0 = vcmask 64512   ;;  %v456_v10 = vld [vmem:[%s3994_s2 + $0x8] sm:$0xff]  ;;  %v3299_v12 = vmov 1983009808   ;;  %v768_v14 = vlaneseq }
  0x14   : > { %2993 = vmatprep.subr.mxu0 %v356_v0  ;;  %3021 = vmatprep.subr.mxu1 %v356_v0  ;;  %v455_v5 = vld [vmem:[%s3994_s2] sm:$0xff]  ;;  %v766_v13 = vunpack.c.l.s4 %v3299_v12  ;;  %v3300_v20 = vmov 1934713408   ;;  %v3301_v60 = vmov 0.0   ;;  %vm955_vm1 = vcmask 130048  }
  0x15   : > { %2994 = vmatpush3.msra.mxu0 %v356_v0  ;;  %3022 = vmatpush3.msra.mxu1 %v356_v0  ;;  %s2973_s24 = sshll.u32 %s3420_s23, 5  ;;  %v769_v18 = vshrl.u32 %v768_v14, 7  ;;  %v798_v21 = vunpack.c.l.s4 %v3300_v20  ;;  %vm957_vm2 = vcmask 261120   ;;  %vm959_vm3 = vcmask 392192   ;;  %s2974_s28 = sshll.u32 %s3420_s23, 3 }
  0x16   : > { %s345_s27 = scalar_lea.vmem %s3992_s0, %s2973_s24  ;;  %v767_v17 = vunpack.c.0.s8 %v766_v13  ;;  %s3305_s24 = smov 16   ;;  %vm961_vm4 = vcmask 523264   ;;  %vm963_vm5 = vcmask 654336   ;;  %vm965_vm6 = vcmask 785408  }
  0x17   : > { %v352_v1 = vld [vmem:[%s345_s27] sm:$0xff]  ;;  %v354_v2 = vld [vmem:[%s345_s27 + $0x10] sm:$0xff]  ;;  %v353_v3 = vld [vmem:[%s345_s27 + $0x8] sm:$0xff]  ;;  %v799_v28 = vunpack.c.0.s8 %v798_v21  ;;  %vm967_vm7 = vcmask 916480   ;;  %s3313_s23 = smov 113   ;;  %vm1051_vm11 = vcmask 1041408  }
  0x18   : > { %2995 = vmatprep.mubr.msk.f32.mxu0 %vm357_vm0, %v352_v1  ;;  %2998 = vmatprep.mubr.msk.f32.mxu1 %vm357_vm0, %v354_v2  ;;  %v355_v4 = vld [vmem:[%s345_s27 + $0x18] sm:$0xff]  ;;  %v770_v24 = vsub.s32 %v767_v17, %v769_v18  ;;  %s3308_s27 = smov 112  }
  0x19   : > { %2996 = vmatmul.mubr.msk.f32.vlgmr.msra.gmra.mxu0 %vm357_vm0, %v353_v3  ;;  %2999 = vmatmul.mubr.msk.f32.vlgmr.msra.gmra.mxu1 %vm357_vm0, %v355_v4  ;;  %v802_v40 = vsub.s32 %v799_v28, %v769_v18 }
  0x1a   : > { %3003 = vmatprep.mubr.msk.f32.mxu1 %vm357_vm0, %v455_v5  ;;  %3013 = vmatprep.mubr.msk.f32.mxu0 %vm357_vm0, %v455_v5 }
  0xd9   : > { %v2997_v6 = vpop.f32.mrf.mxu0  ;;  %v3000_v7 = vpop.f32.mrf.mxu1 }
  0xdb   : > { %v436_v8 = vpop.f32.mrf.mxu0  ;;  %v446_v9 = vpop.f32.mrf.mxu1 }
  0xdc   : > { %3001 = vmatprep.subr.mxu1 %v436_v8  ;;  %3011 = vmatprep.subr.mxu0 %v446_v9 }
  0xdd   : > { %3002 = vmatpush3.msra.mxu1 %v436_v8  ;;  %3012 = vmatpush3.msra.mxu0 %v446_v9 }
  0xde   : > { %3004 = vmatmul.mubr.msk.f32.vlgmr.msra.gmra.mxu1 %vm357_vm0, %v456_v10  ;;  %3006 = vmatprep.subr.mxu1 %v2997_v6 }
  0xdf   : > { %3014 = vmatmul.mubr.msk.f32.vlgmr.msra.gmra.mxu0 %vm357_vm0, %v456_v10  ;;  %3007 = vmatpush3.msra.mxu1 %v2997_v6 }
  0xe0   : > { %3008 = vmatprep.mubr.msk.f32.mxu1 %vm357_vm0, %v455_v5  ;;  %3016 = vmatprep.subr.mxu1 %v3000_v7 }
  0xe2   : > { %3009 = vmatmul.mubr.msk.f32.vlgmr.msra.gmra.mxu1 %vm357_vm0, %v456_v10 }
  0xe3   : > { %3017 = vmatpush3.msra.mxu1 %v3000_v7  ;;  %3018 = vmatprep.mubr.msk.f32.mxu1 %vm357_vm0, %v455_v5 }
  0xe6   : > { %3019 = vmatmul.mubr.msk.f32.vlgmr.msra.gmra.mxu1 %vm357_vm0, %v456_v10 }
 0x19e   : > { %v3005_v11 = vpop.f32.mrf.mxu1 }
 0x19f   : > { %v3015_v15 = vpop.f32.mrf.mxu0 }
 0x1a0   : > { %v529_v16 = vpop.f32.mrf.mxu1  ;;  %v831_v25 = vcombine.low %v3005_v11, %v3015_v15  ;;  %v832_v26 = vcombine.high %v3005_v11, %v3015_v15 }
 0x1a1   : > { %v679_v22 = vpop.f32.mrf.mxu0 }
 0x1a2   : > { %v3010_v19 = vpop.f32.mrf.mxu1  ;;  %v763_v29 = vcombine.low %v529_v16, %v679_v22  ;;  %v764_v30 = vcombine.high %v529_v16, %v679_v22  ;;  %v839_v38 = vrot.slane %v831_v25, %v770_v24  ;;  %v846_v39 = vrot.slane %v832_v26, %v770_v24 }
 0x1a4   : > { %v604_v23 = vpop.f32.mrf.mxu1  ;;  %v771_v41 = vrot.slane %v763_v29, %v770_v24  ;;  %v778_v42 = vrot.slane %v764_v30, %v770_v24 }
 0x1a6   : > { %v3020_v27 = vpop.f32.mrf.mxu1 }
 0x1a7   : > { %v847_v31 = vcombine.low %v3010_v19, %v3020_v27  ;;  %v848_v32 = vcombine.high %v3010_v19, %v3020_v27 }
 0x1a8   : > { %v754_v33 = vpop.f32.mrf.mxu1 }
 0x1a9   : > { %v855_v34 = vrot.slane %v847_v31, %v770_v24  ;;  %v862_v35 = vrot.slane %v848_v32, %v770_v24  ;;  %v779_v36 = vcombine.low %v604_v23, %v754_v33  ;;  %v780_v37 = vcombine.high %v604_v23, %v754_v33 }
 0x1ab   : > { %v787_v43 = vrot.slane %v779_v36, %v770_v24  ;;  %v794_v44 = vrot.slane %v780_v37, %v770_v24  ;;  %v863_v45 = vcombine.low %v839_v38, %v855_v34  ;;  %v879_v46 = vcombine.low %v846_v39, %v862_v35 }
 0x1ac   : > { %v864_v47 = vcombine.high %v839_v38, %v855_v34  ;;  %v880_v63 = vcombine.high %v846_v39, %v862_v35 }
 0x1ad   : > { %v795_v48 = vcombine.low %v771_v41, %v787_v43  ;;  %v811_v49 = vcombine.low %v778_v42, %v794_v44  ;;  %v796_v50 = vcombine.high %v771_v41, %v787_v43  ;;  %v887_v53 = vrot.slane %v879_v46, %v802_v40 }
 0x1ae   : > { %v878_v54 = vrot.slane %v864_v47, %v802_v40  ;;  %v871_v55 = vrot.slane %v863_v45, %v802_v40  ;;  %v812_v57 = vcombine.high %v778_v42, %v794_v44  ;;  %v894_v6 = vrot.slane %v880_v63, %v802_v40 }
 0x1af   : > { %v803_v51 = vrot.slane %v795_v48, %v802_v40  ;;  %v819_v52 = vrot.slane %v811_v49, %v802_v40  ;;  %v810_v56 = vrot.slane %v796_v50, %v802_v40  ;;  %v897_v7 = vcombine.high %v887_v53, %v3301_v60 }
 0x1b0   : > { %v896_v0 = vcombine.high %v878_v54, %v3301_v60  ;;  %v895_v1 = vcombine.high %v871_v55, %v3301_v60  ;;  %v826_v3 = vrot.slane %v812_v57, %v802_v40  ;;  %v898_v11 = vcombine.high %v894_v6, %v3301_v60 }
 0x1b1   : > { %v3084_v58 = vpack.i.bf16 %v887_v53, %v819_v52  ;;  %v3079_v59 = vpack.i.bf16 %v878_v54, %v810_v56  ;;  %v828_v61 = vcombine.high %v810_v56, %v3301_v60  ;;  %v827_v62 = vcombine.high %v803_v51, %v3301_v60  ;;  %v2195_v54 = vld [vmem:[%s3999_s7] sm:$0xf] }
 0x1b2   : > { %v829_v4 = vcombine.high %v819_v52, %v3301_v60  ;;  %v3099_v8 = vpack.i.bf16 %v894_v6, %v826_v3  ;;  %v830_v10 = vcombine.high %v826_v3, %v3301_v60  ;;  %v3309_v49 = vmov 0   ;;  %v2942_v60 = vld [vmem:[%s3998_s6 + $0x2] sm:$0x3] }
 0x1b3   : > { %3085 = vrot.lane.b32.xlu1 %v3084_v58, %s3302_s17  ;;  %3080 = vrot.lane.b32.xlu0 %v3079_v59, %s3303_s21  ;;  %v3094_v2 = vpack.i.bf16 %v896_v0, %v828_v61  ;;  %v3089_v5 = vpack.i.bf16 %v895_v1, %v827_v62  ;;  %s350_s17 = scalar_lea.vmem %s3993_s1, %s2974_s28  ;;  %s3311_s21 = smov 1  }
 0x1b4   : > { %v3104_v9 = vpack.i.bf16 %v897_v7, %v829_v4  ;;  %v3109_v12 = vpack.i.bf16 %v898_v11, %v830_v10  ;;  %1090 = vmatprep.mubr.bf16.mxu0 %v3309_v49  ;;  %1140 = vmatprep.mubr.bf16.mxu1 %v3309_v49  ;;  %s2975_s28 = sshll.u32 %s3388_s13, 7 }
 0x1b5   : > { %3194 = vset.pattern.permute.xlu1 %v3309_v49  ;;  %3235 = vset.pattern.permute.xlu0 %v3309_v49 }
 0x1b7   : > { %3095 = vrot.lane.b32.xlu1 %v3094_v2, %s3304_s22  ;;  %3090 = vrot.lane.b32.xlu0 %v3089_v5, %s3305_s24  ;;  %s3312_s22 = smov 15  }
 0x1bb   : > { %3100 = vrot.lane.b32.xlu1 %v3099_v8, %s3306_s25  ;;  %3105 = vrot.lane.b32.xlu0 %v3104_v9, %s3307_s26  ;;  %s3314_s25 = smov 127   ;;  %s3315_s26 = smov 111  }
 0x1bf   : > { %3110 = vrot.lane.b32.xlu0 %v3109_v12, %s3308_s27 }
 0x225   : > { %v3086_v13 = vpop.permute.xlu1 %3085  ;;  %v3081_v15 = vpop.permute.xlu0 %3080 }
 0x226   : > { %v3083_v20 = vunpack.i.h.bf16 %v3081_v15  ;;  %v3082_v21 = vunpack.i.l.bf16 %v3081_v15  ;;  %v3088_v27 = vunpack.i.h.bf16 %v3086_v13  ;;  %v3087_v28 = vunpack.i.l.bf16 %v3086_v13 }
 0x229   : > { %v3096_v16 = vpop.permute.xlu1 %3095  ;;  %v3091_v17 = vpop.permute.xlu0 %3090 }
 0x22a   : > { %v3093_v18 = vunpack.i.h.bf16 %v3091_v17  ;;  %v3092_v19 = vunpack.i.l.bf16 %v3091_v17  ;;  %v3098_v22 = vunpack.i.h.bf16 %v3096_v16  ;;  %v3097_v23 = vunpack.i.l.bf16 %v3096_v16 }
 0x22c   : > { %v969_v24 = vsel %vm955_vm1, %v871_v55, %v3093_v18  ;;  %v956_v25 = vsel %vm955_vm1, %v803_v51, %v3092_v19  ;;  %v3473_v51 = vld [vmem:[%s350_s17] sm:$0xff]  ;;  %v3497_v55 = vand.u32 127, %v768_v14 }
 0x22d   : > { %v3101_v26 = vpop.permute.xlu1 %3100  ;;  %v970_v29 = vsel %vm957_vm2, %v969_v24, %v3083_v20  ;;  %v958_v30 = vsel %vm957_vm2, %v956_v25, %v3082_v21  ;;  %v3106_v31 = vpop.permute.xlu0 %3105  ;;  %v3477_v52 = vcombine.high %v3473_v51, %v3473_v51 }
 0x22e   : > { %v3108_v32 = vunpack.i.h.bf16 %v3106_v31  ;;  %v3107_v33 = vunpack.i.l.bf16 %v3106_v31  ;;  %v960_v34 = vsel %vm959_vm3, %v958_v30, %v3097_v23  ;;  %v971_v35 = vsel %vm959_vm3, %v970_v29, %v3098_v22 }
 0x22f   : > { %v3103_v36 = vunpack.i.h.bf16 %v3101_v26  ;;  %v3102_v37 = vunpack.i.l.bf16 %v3101_v26  ;;  %v962_v38 = vsel %vm961_vm4, %v960_v34, %v3087_v28  ;;  %v972_v39 = vsel %vm961_vm4, %v971_v35, %v3088_v27 }
 0x230   : > { %v964_v40 = vsel %vm963_vm5, %v962_v38, %v3107_v33  ;;  %v973_v41 = vsel %vm963_vm5, %v972_v39, %v3108_v32  ;;  %v3154_v53 = vpack.i.bf16 %v3477_v52, %v3473_v51  ;;  %v3500_v56 = vadd.s32 128, %v3497_v55  ;;  %v2890_v38 = vld [vmem:[%s3996_s4 + $0x2] sm:$0x3]  ;;  %v1012_v39 = vld [vmem:[%s3996_s4] sm:$0x3] }
 0x231   : > { %v3111_v42 = vpop.permute.xlu0 %3110  ;;  %v966_v45 = vsel %vm965_vm6, %v964_v40, %v3102_v37  ;;  %v974_v46 = vsel %vm965_vm6, %v973_v41, %v3103_v36  ;;  %v984_v57 = vand.u32 15, %v3497_v55  ;;  %vm4004_vm8 = vcmp.ge.s32.totalorder %v3497_v55, 16 }
 0x232   : > { %v3113_v43 = vunpack.i.h.bf16 %v3111_v42  ;;  %v3112_v44 = vunpack.i.l.bf16 %v3111_v42  ;;  %v991_v58 = vand.u32 15, %v3500_v56  ;;  %vm4008_vm10 = vcmp.lt.s32.totalorder %v3497_v55, 17 }
 0x233   : > { %vm3505_vm9 = vcmp.ge.s32.totalorder %v984_v57, 1  ;;  %vm4006_vm13 = vcmp.lt.s32.totalorder %v3497_v55, 16  ;;  %vm4002_vm14 = vcmp.lt.s32.totalorder %v3497_v55, 1  ;;  %vm4007_vm15 = vcmp.lt.s32.totalorder %v3497_v55, 15 }
 0x234   : > { %v3455_v47 = vsel %vm967_vm7, %v966_v45, %v3112_v44  ;;  %v3457_v48 = vsel %vm967_vm7, %v974_v46, %v3113_v43  ;;  %vm3510_vm12 = vcmp.ge.s32.totalorder %v991_v58, 1  ;;  %vm3521_vm0 = vmand %vm4004_vm8, %vm3505_vm9  ;;  %vm3525_vm1 = vcmp.le.s32.totalorder %v991_v58, 14 }
 0x235   : > { %v3119_v50 = vpack.i.bf16 %v3457_v48, %v3455_v47  ;;  %vm4005_vm2 = vcmp.lt.s32.totalorder %v3497_v55, 113  ;;  %vm4003_vm3 = vcmp.lt.s32.totalorder %v3497_v55, 127  ;;  %vm3531_vm4 = vcmp.le.s32.totalorder %v984_v57, 14 }
 0x236   : > { %vm1047_vm5 = vcmask 31744   ;;  %vm3562_vm6 = vmand %vm4004_vm8, %vm3531_vm4  ;;  %vm1007_vm7 = vcmp.lt.s32.totalorder %v3500_v56, 240  ;;  %v2950_v56 = vld [vmem:[%s3998_s6 + $0x6] sm:$0x3] }
 0x237   : > { %3120 = vrot.lane.b32.xlu0 %v3119_v50, %s3310_s29  ;;  %3115 = vrot.lane.b32.xlu1 %v3119_v50, %s3305_s24 }
 0x23b   : > { %3130 = vrot.lane.b32.xlu0 %v3119_v50, %s3311_s21  ;;  %3125 = vrot.lane.b32.xlu1 %v3119_v50, %s3312_s22 }
 0x23f   : > { %3140 = vrot.lane.b32.xlu0 %v3119_v50, %s3313_s23  ;;  %3135 = vrot.lane.b32.xlu1 %v3119_v50, %s3314_s25 }
 0x243   : > { %3150 = vrot.lane.b32.xlu0 %v3119_v50, %s3315_s26  ;;  %3145 = vrot.lane.b32.xlu1 %v3119_v50, %s3308_s27 }
 0x247   : > { %3155 = vrot.lane.b32.xlu1 %v3154_v53, %s3310_s29  ;;  %3160 = vrot.lane.b32.xlu0 %v3154_v53, %s3305_s24 }
 0x24b   : > { %3165 = vrot.lane.b32.xlu1 %v3154_v53, %s3312_s22  ;;  %3170 = vrot.lane.b32.xlu0 %v3154_v53, %s3311_s21 }
 0x24f   : > { %3180 = vrot.lane.b32.xlu0 %v3154_v53, %s3313_s23  ;;  %3175 = vrot.lane.b32.xlu1 %v3154_v53, %s3314_s25 }
 0x253   : > { %3185 = vrot.lane.b32.xlu1 %v3154_v53, %s3308_s27  ;;  %3190 = vrot.lane.b32.xlu0 %v3154_v53, %s3315_s26 }
 0x257   : > { %2198 = vperm.xlu1 %3194, %v2195_v54  }
 0x2a9   : > { %v3121_v14 = vpop.permute.xlu0 %3120  ;;  %v3116_v61 = vpop.permute.xlu1 %3115 }
 0x2aa   : > { %v3123_v62 = vunpack.i.h.bf16 %v3121_v14  ;;  %v3122_v63 = vunpack.i.l.bf16 %v3121_v14  ;;  %v3118_v0 = vunpack.i.h.bf16 %v3116_v61  ;;  %v3117_v1 = vunpack.i.l.bf16 %v3116_v61 }
 0x2ab   : > { %v1292_v61 = vpack.c.bf16 %v3457_v48, %v3457_v48 }
 0x2ac   : > { %v1018_v5 = vsel %vm4008_vm10, %v3122_v63, %v3123_v62  ;;  %v1019_v6 = vsel %vm4008_vm10, %v3123_v62, %v3122_v63  ;;  %v1037_v7 = vsel %vm4006_vm13, %v3117_v1, %v3118_v0  ;;  %v1038_v8 = vsel %vm4006_vm13, %v3118_v0, %v3117_v1 }
 0x2ad   : > { %v1027_v9 = vsel %vm3510_vm12, %v1018_v5, 0.0  ;;  %v1046_v10 = vpack.c.bf16 %v1037_v7, %v1037_v7  ;;  %v3131_v11 = vpop.permute.xlu0 %3130  ;;  %v3126_v12 = vpop.permute.xlu1 %3125  ;;  %v1026_v13 = vsel %vm3521_vm0, %v1019_v6, 0.0  ;;  %v1043_v15 = vsel %vm4004_vm8, %v1038_v8, 0.0 }
 0x2ae   : > { %v3133_v16 = vunpack.i.h.bf16 %v3131_v11  ;;  %v3132_v17 = vunpack.i.l.bf16 %v3131_v11  ;;  %v3128_v18 = vunpack.i.h.bf16 %v3126_v12  ;;  %v3127_v19 = vunpack.i.l.bf16 %v3126_v12 }
 0x2af   : > { %2891 = vmatprep.subr.msk.bf16.mxu0 %vm1051_vm11, %v1046_v10  ;;  %v1029_v20 = vpack.c.bf16 %v1027_v9, %v1027_v9  ;;  %v1028_v21 = vpack.c.bf16 %v1026_v13, %v1026_v13  ;;  %v1045_v22 = vpack.c.bf16 %v1043_v15, %v1043_v15  ;;  %v1291_v8 = vpack.c.bf16 %v3455_v47, %v3455_v47 }
 0x2b0   : > { %v1227_v23 = vsel %vm4002_vm14, %v3132_v17, %v3133_v16  ;;  %v1228_v24 = vsel %vm4002_vm14, %v3133_v16, %v3132_v17  ;;  %v1156_v25 = vsel %vm4007_vm15, %v3127_v19, %v3128_v18  ;;  %v1157_v26 = vsel %vm4007_vm15, %v3128_v18, %v3127_v19  ;;  %v2895_v16 = vld [vmem:[%s3996_s4 + $0x4] sm:$0x3]  ;;  %v2898_v17 = vld [vmem:[%s3996_s4 + $0x6] sm:$0x3] }
 0x2b1   : > { %v1234_v28 = vsel %vm3510_vm12, %v1227_v23, 0.0  ;;  %v1165_v29 = vsel %vm3525_vm1, %v1156_v25, 0.0  ;;  %2893 = vmatprep.subr.msk.bf16.mxu1 %vm1051_vm11, %v1029_v20  ;;  %v3141_v30 = vpop.permute.xlu0 %3140  ;;  %v1103_v31 = vsel %vm1051_vm11, %v1028_v21, 0  ;;  %v3136_v32 = vpop.permute.xlu1 %3135  ;;  %v1053_v33 = vsel %vm1051_vm11, %v1045_v22, 0 }
 0x2b2   : > { %v3143_v34 = vunpack.i.h.bf16 %v3141_v30  ;;  %v3142_v35 = vunpack.i.l.bf16 %v3141_v30  ;;  %1123 = vmatpush1.bf16.msra.mxu1 %v1103_v31  ;;  %v3138_v36 = vunpack.i.h.bf16 %v3136_v32  ;;  %v3137_v37 = vunpack.i.l.bf16 %v3136_v32  ;;  %1073 = vmatpush1.bf16.msra.mxu0 %v1053_v33 }
 0x2b3   : > { %v1167_v40 = vpack.c.bf16 %v1165_v29, %v1165_v29  ;;  %v1236_v41 = vpack.c.bf16 %v1234_v28, %v1234_v28  ;;  %v1233_v42 = vsel %vm3505_vm9, %v1228_v24, 0.0  ;;  %v1164_v43 = vsel %vm3562_vm6, %v1157_v26, 0.0 }
 0x2b4   : > { %v1352_v44 = vsel %vm4003_vm3, %v3137_v37, %v3138_v36  ;;  %v1353_v45 = vsel %vm4003_vm3, %v3138_v36, %v3137_v37  ;;  %v1235_v50 = vpack.c.bf16 %v1233_v42, %v1233_v42  ;;  %vm1491_vm14 = vcmp.lt.s32.totalorder %v3497_v55, 112  ;;  %vm3603_vm3 = vmand %vm1007_vm7, %vm3510_vm12  ;;  %v2901_v36 = vld [vmem:[%s3996_s4 + $0x8] sm:$0x3]  ;;  %v2904_v37 = vld [vmem:[%s3996_s4 + $0xa] sm:$0x3] }
 0x2b5   : > { %v1359_v46 = vsel %vm3525_vm1, %v1353_v45, 0.0  ;;  %2892 = vmatmul.mubr.msk.bf16.vlgmr.msra.gmra.mxu0 %vm1047_vm5, %v2890_v38  ;;  %2894 = vmatmul.mubr.msk.bf16.vlgmr.msra.gmra.mxu1 %vm1047_vm5, %v1012_v39  ;;  %v3146_v53 = vpop.permute.xlu1 %3145  ;;  %v1166_v54 = vpack.c.bf16 %v1164_v43, %v1164_v43  ;;  %v1422_v57 = vsel %vm4005_vm2, %v3143_v34, %v3142_v35  ;;  %v3151_v63 = vpop.permute.xlu0 %3150  ;;  %v1358_v48 = vsel %vm3531_vm4, %v1352_v44, 0.0 }
 0x2b6   : > { %2896 = vmatprep.subr.msk.bf16.mxu0 %vm1051_vm11, %v1167_v40  ;;  %2899 = vmatprep.subr.msk.bf16.mxu1 %vm1051_vm11, %v1236_v41  ;;  %v3148_v58 = vunpack.i.h.bf16 %v3146_v53  ;;  %v3147_v14 = vunpack.i.l.bf16 %v3146_v53  ;;  %v1241_v0 = vsel %vm1051_vm11, %v1235_v50, 0  ;;  %v1361_v5 = vpack.c.bf16 %v1359_v46, %v1359_v46 }
 0x2b7   : > { %v1172_v1 = vsel %vm1051_vm11, %v1166_v54, 0  ;;  %1209 = vmatprep.mubr.bf16.mxu0 %v3309_v49  ;;  %1278 = vmatprep.mubr.bf16.mxu1 %v3309_v49  ;;  %v1360_v9 = vpack.c.bf16 %v1358_v48, %v1358_v48  ;;  %v1421_v11 = vsel %vm4005_vm2, %v3142_v35, %v3143_v34  ;;  %v1430_v12 = vsel %vm3603_vm3, %v1422_v57, 0.0  ;;  %vm3642_vm2 = vmand %vm1007_vm7, %vm3525_vm1  ;;  %v2910_v48 = vld [vmem:[%s3996_s4 + $0xe] sm:$0x3] }
 0x2b8   : > { %1261 = vmatpush1.bf16.msra.mxu1 %v1241_v0  ;;  %v1493_v6 = vsel %vm1491_vm14, %v3148_v58, %v3147_v14  ;;  %1192 = vmatpush1.bf16.msra.mxu0 %v1172_v1  ;;  %v3153_v13 = vunpack.i.h.bf16 %v3151_v63  ;;  %v3152_v15 = vunpack.i.l.bf16 %v3151_v63  ;;  %vm4009_vm8 = vcmp.lt.s32.totalorder %v3497_v55, 111 }
 0x2b9   : > { %v1499_v7 = vsel %vm1007_vm7, %v1493_v6, 0.0  ;;  %2902 = vmatprep.subr.msk.bf16.mxu0 %vm1051_vm11, %v1292_v61  ;;  %2905 = vmatprep.subr.msk.bf16.mxu1 %vm1051_vm11, %v1361_v5  ;;  %v3156_v10 = vpop.permute.xlu1 %3155  ;;  %v1297_v20 = vsel %vm1051_vm11, %v1291_v8, 0  ;;  %v1366_v21 = vsel %vm1051_vm11, %v1360_v9, 0  ;;  %v1432_v22 = vpack.c.bf16 %v1430_v12, %v1430_v12  ;;  %v3161_v38 = vpop.permute.xlu0 %3160  ;;  %v2907_v5 = vld [vmem:[%s3996_s4 + $0xc] sm:$0x3] }
 0x2ba   : > { %v1501_v47 = vpack.c.bf16 %v1499_v7, %v1499_v7  ;;  %v3158_v18 = vunpack.i.h.bf16 %v3156_v10  ;;  %v3157_v19 = vunpack.i.l.bf16 %v3156_v10  ;;  %v1429_v23 = vsel %vm3505_vm9, %v1421_v11, 0.0 }
 0x2bb   : > { %v1562_v25 = vsel %vm4009_vm8, %v3153_v13, %v3152_v15  ;;  %v1492_v26 = vsel %vm1491_vm14, %v3147_v14, %v3148_v58  ;;  %v1431_v30 = vpack.c.bf16 %v1429_v23, %v1429_v23  ;;  %v1561_v35 = vsel %vm4009_vm8, %v3152_v15, %v3153_v13 }
 0x2bc   : > { %v1633_v28 = vsel %vm4008_vm10, %v3157_v19, %v3158_v18  ;;  %v1570_v31 = vsel %vm3642_vm2, %v1562_v25, 0.0  ;;  %v1500_v32 = vpack.c.bf16 %v1492_v26, %v1492_v26  ;;  %v1634_v33 = vsel %vm4008_vm10, %v3158_v18, %v3157_v19 }
 0x2bd   : > { %2897 = vmatmul.mubr.msk.bf16.vlgmr.msra.gmra.mxu0 %vm1047_vm5, %v2895_v16  ;;  %2900 = vmatmul.mubr.msk.bf16.vlgmr.msra.gmra.mxu1 %vm1047_vm5, %v2898_v17  ;;  %v3166_v29 = vpop.permute.xlu1 %3165  ;;  %v1636_v34 = vsel %vm3510_vm12, %v1633_v28, 0.0  ;;  %v1437_v41 = vsel %vm1051_vm11, %v1431_v30, 0  ;;  %v1572_v42 = vpack.c.bf16 %v1570_v31, %v1570_v31  ;;  %v1635_v44 = vsel %vm3521_vm0, %v1634_v33, 0.0  ;;  %v3171_v58 = vpop.permute.xlu0 %3170 }
 0x2be   : > { %1317 = vmatpush1.bf16.msra.mxu0 %v1297_v20  ;;  %1386 = vmatpush1.bf16.msra.mxu1 %v1366_v21  ;;  %v3168_v39 = vunpack.i.h.bf16 %v3166_v29  ;;  %v3167_v40 = vunpack.i.l.bf16 %v3166_v29  ;;  %v1638_v43 = vpack.c.bf16 %v1636_v34, %v1636_v34  ;;  %v1506_v45 = vsel %vm1051_vm11, %v1500_v32, 0  ;;  %v2913_v21 = vld [vmem:[%s3996_s4 + $0x10] sm:$0x3] }
 0x2bf   : > { %2908 = vmatprep.subr.msk.bf16.mxu0 %vm1051_vm11, %v1432_v22  ;;  %2911 = vmatprep.subr.msk.bf16.mxu1 %vm1051_vm11, %v1501_v47  ;;  %v1569_v46 = vsel %vm3531_vm4, %v1561_v35, 0.0  ;;  %v3163_v50 = vunpack.i.h.bf16 %v3161_v38  ;;  %v3162_v53 = vunpack.i.l.bf16 %v3161_v38  ;;  %v1637_v57 = vpack.c.bf16 %v1635_v44, %v1635_v44  ;;  %v1625_v22 = vld [vmem:[%s3997_s5] sm:$0x3] }
 0x2c0   : > { %1334 = vmatprep.mubr.bf16.mxu0 %v3309_v49  ;;  %1403 = vmatprep.mubr.bf16.mxu1 %v3309_v49  ;;  %v1761_v54 = vsel %vm4007_vm15, %v3167_v40, %v3168_v39  ;;  %v1571_v14 = vpack.c.bf16 %v1569_v46, %v1569_v46  ;;  %v1762_v0 = vsel %vm4007_vm15, %v3168_v39, %v3167_v40  ;;  %v3173_v6 = vunpack.i.h.bf16 %v3171_v58 }
 0x2c1   : > { %v1697_v61 = vsel %vm4006_vm13, %v3162_v53, %v3163_v50  ;;  %v1698_v63 = vsel %vm4006_vm13, %v3163_v50, %v3162_v53  ;;  %v1764_v1 = vsel %vm3525_vm1, %v1761_v54, 0.0  ;;  %v3172_v7 = vunpack.i.l.bf16 %v3171_v58  ;;  %v3181_v47 = vpop.permute.xlu0 %3180  ;;  %v3176_v18 = vpop.permute.xlu1 %3175 }
 0x2c2   : > { %v1643_v8 = vsel %vm1051_vm11, %v1637_v57, 0  ;;  %v1702_v9 = vpack.c.bf16 %v1697_v61, %v1697_v61  ;;  %v1766_v10 = vpack.c.bf16 %v1764_v1, %v1764_v1  ;;  %vm4028_vm13 = vcmp.ge.s32.totalorder %v3497_v55, 16 }
 0x2c3   : > { %v1699_v11 = vsel %vm4028_vm13, %v1698_v63, 0.0  ;;  %v1763_v12 = vsel %vm3562_vm6, %v1762_v0, 0.0  ;;  %v1577_v13 = vsel %vm1051_vm11, %v1571_v14, 0  ;;  %vm4029_vm15 = vcmp.lt.s32.totalorder %v3497_v55, 1 }
 0x2c4   : > { %v1825_v15 = vsel %vm4029_vm15, %v3172_v7, %v3173_v6  ;;  %v1701_v16 = vpack.c.bf16 %v1699_v11, %v1699_v11  ;;  %v1765_v17 = vpack.c.bf16 %v1763_v12, %v1763_v12  ;;  %vm4030_vm13 = vmmov %vm4029_vm15  ;;  %v3183_v23 = vunpack.i.h.bf16 %v3181_v47 }
 0x2c5   : > { %2903 = vmatmul.mubr.msk.bf16.vlgmr.msra.gmra.mxu0 %vm1047_vm5, %v2901_v36  ;;  %2906 = vmatmul.mubr.msk.bf16.vlgmr.msra.gmra.mxu1 %vm1047_vm5, %v2904_v37  ;;  %v1826_v19 = vsel %vm4030_vm13, %v3173_v6, %v3172_v7  ;;  %v1828_v20 = vsel %vm3510_vm12, %v1825_v15, 0.0  ;;  %v3182_v25 = vunpack.i.l.bf16 %v3181_v47  ;;  %v3178_v26 = vunpack.i.h.bf16 %v3176_v18  ;;  %v3186_v37 = vpop.permute.xlu1 %3185  ;;  %v3191_v38 = vpop.permute.xlu0 %3190 }
 0x2c6   : > { %1457 = vmatpush1.bf16.msra.mxu0 %v1437_v41  ;;  %1526 = vmatpush1.bf16.msra.mxu1 %v1506_v45  ;;  %v3177_v28 = vunpack.i.l.bf16 %v3176_v18  ;;  %v1707_v29 = vsel %vm1051_vm11, %v1701_v16, 0  ;;  %v1771_v30 = vsel %vm1051_vm11, %v1765_v17, 0  ;;  %v1830_v31 = vpack.c.bf16 %v1828_v20, %v1828_v20  ;;  %v2930_v18 = vld [vmem:[%s3997_s5 + $0xa] sm:$0x3] }
 0x2c7   : > { %2914 = vmatprep.subr.msk.bf16.mxu0 %vm1051_vm11, %v1572_v42  ;;  %1474 = vmatprep.mubr.bf16.mxu0 %v3309_v49  ;;  %v1886_v32 = vpack.c.bf16 %v3477_v52, %v3477_v52  ;;  %v1827_v33 = vsel %vm3505_vm9, %v1826_v19, 0.0  ;;  %vm4031_vm15 = vcmp.lt.s32.totalorder %v3497_v55, 113  ;;  %vm4032_vm13 = vcmp.lt.s32.totalorder %v3497_v55, 127  ;;  %v2933_v19 = vld [vmem:[%s3997_s5 + $0xc] sm:$0x3] }
 0x2c8   : > { %1543 = vmatprep.mubr.bf16.mxu1 %v3309_v49  ;;  %2916 = vmatprep.subr.msk.bf16.mxu1 %vm1051_vm11, %v1638_v43  ;;  %v2010_v34 = vsel %vm4031_vm15, %v3183_v23, %v3182_v25  ;;  %v1946_v35 = vsel %vm4032_vm13, %v3178_v26, %v3177_v28  ;;  %v1829_v52 = vpack.c.bf16 %v1827_v33, %v1827_v33  ;;  %vm4033_vm10 = vmmov %vm4031_vm15  ;;  %v2921_v43 = vld [vmem:[%s3997_s5 + $0x4] sm:$0x3]  ;;  %v3188_v44 = vunpack.i.h.bf16 %v3186_v37 }
 0x2c9   : > { %v1885_v36 = vpack.c.bf16 %v3473_v51, %v3473_v51  ;;  %v2009_v39 = vsel %vm4033_vm10, %v3182_v25, %v3183_v23  ;;  %v2012_v40 = vsel %vm3603_vm3, %v2010_v34, 0.0  ;;  %vm4034_vm15 = vmmov %vm4032_vm13  ;;  %v1948_v42 = vsel %vm3525_vm1, %v1946_v35, 0.0  ;;  %v2918_v51 = vld [vmem:[%s3997_s5 + $0x2] sm:$0x3]  ;;  %v2939_v23 = vld [vmem:[%s3997_s5 + $0x10] sm:$0x3] }
 0x2ca   : > { %v1945_v41 = vsel %vm4034_vm15, %v3177_v28, %v3178_v26  ;;  %v3187_v45 = vunpack.i.l.bf16 %v3186_v37  ;;  %v3193_v46 = vunpack.i.h.bf16 %v3191_v38  ;;  %v3192_v50 = vunpack.i.l.bf16 %v3191_v38 }
 0x2cb   : > { %v1835_v53 = vsel %vm1051_vm11, %v1829_v52, 0  ;;  %v1891_v54 = vsel %vm1051_vm11, %v1885_v36, 0  ;;  %v1950_v57 = vpack.c.bf16 %v1948_v42, %v1948_v42  ;;  %v2014_v58 = vpack.c.bf16 %v2012_v40, %v2012_v40 }
 0x2cc   : > { %v1947_v14 = vsel %vm3531_vm4, %v1945_v41, 0.0  ;;  %v2011_v61 = vsel %vm3505_vm9, %v2009_v39, 0.0  ;;  %v2074_v63 = vsel %vm1491_vm14, %v3188_v44, %v3187_v45  ;;  %v2138_v0 = vsel %vm4009_vm8, %v3193_v46, %v3192_v50 }
 0x2cd   : > { %2909 = vmatmul.mubr.msk.bf16.vlgmr.msra.gmra.mxu0 %vm1047_vm5, %v2907_v5  ;;  %2912 = vmatmul.mubr.msk.bf16.vlgmr.msra.gmra.mxu1 %vm1047_vm5, %v2910_v48  ;;  %v1949_v1 = vpack.c.bf16 %v1947_v14, %v1947_v14  ;;  %v2013_v5 = vpack.c.bf16 %v2011_v61, %v2011_v61  ;;  %v2076_v48 = vsel %vm1007_vm7, %v2074_v63, 0.0  ;;  %v2137_v6 = vsel %vm4009_vm8, %v3192_v50, %v3193_v46 }
 0x2ce   : > { %1597 = vmatpush1.bf16.msra.mxu0 %v1577_v13  ;;  %1663 = vmatpush1.bf16.msra.mxu1 %v1643_v8  ;;  %v2140_v7 = vsel %vm3642_vm2, %v2138_v0, 0.0  ;;  %v2924_v8 = vld [vmem:[%s3997_s5 + $0x6] sm:$0x3]  ;;  %v2078_v12 = vpack.c.bf16 %v2076_v48, %v2076_v48  ;;  %v2073_v13 = vsel %vm1491_vm14, %v3187_v45, %v3188_v44  ;;  %v2139_v16 = vsel %vm3531_vm4, %v2137_v6, 0.0 }
 0x2cf   : > { %1614 = vmatprep.mubr.bf16.mxu0 %v3309_v49  ;;  %1680 = vmatprep.mubr.bf16.mxu1 %v3309_v49  ;;  %v2019_v11 = vsel %vm1051_vm11, %v2013_v5, 0  ;;  %v2142_v15 = vpack.c.bf16 %v2140_v7, %v2140_v7  ;;  %v2077_v17 = vpack.c.bf16 %v2073_v13, %v2073_v13  ;;  %v2141_v47 = vpack.c.bf16 %v2139_v16, %v2139_v16 }
 0x2d0   : > { %2919 = vmatprep.subr.msk.bf16.mxu0 %vm1051_vm11, %v1702_v9  ;;  %2922 = vmatprep.subr.msk.bf16.mxu1 %vm1051_vm11, %v1766_v10  ;;  %v2927_v9 = vld [vmem:[%s3997_s5 + $0x8] sm:$0x3]  ;;  %v1955_v10 = vsel %vm1051_vm11, %v1949_v1, 0  ;;  %vm4035_vm10 = vcmp.lt.s32.totalorder %v3497_v55, 17  ;;  %vm4037_vm15 = vcmp.lt.s32.totalorder %v3497_v55, 16 }
 0x2d1   : > { %v2083_v20 = vsel %vm1051_vm11, %v2077_v17, 0  ;;  %vm4036_vm13 = vmmov %vm4035_vm10 }
 0x2d2   : > { %vm4038_vm8 = vmmov %vm4037_vm15 }
 0x2d5   : > { %2915 = vmatmul.mubr.msk.bf16.vlgmr.msra.gmra.mxu0 %vm1047_vm5, %v2913_v21  ;;  %2917 = vmatmul.mubr.msk.bf16.vlgmr.msra.gmra.mxu1 %vm1047_vm5, %v1625_v22  ;;  %v2147_v21 = vsel %vm1051_vm11, %v2141_v47, 0  ;;  %v2936_v22 = vld [vmem:[%s3997_s5 + $0xe] sm:$0x3] }
 0x2d6   : > { %1727 = vmatpush1.bf16.msra.mxu0 %v1707_v29  ;;  %1791 = vmatpush1.bf16.msra.mxu1 %v1771_v30 }
 0x2d7   : > { %1744 = vmatprep.mubr.bf16.mxu0 %v3309_v49  ;;  %1808 = vmatprep.mubr.bf16.mxu1 %v3309_v49 }
 0x2d8   : > { %2925 = vmatprep.subr.msk.bf16.mxu0 %vm1051_vm11, %v1830_v31  ;;  %2928 = vmatprep.subr.msk.bf16.mxu1 %vm1051_vm11, %v1886_v32 }
 0x2dd   : > { %2920 = vmatmul.mubr.msk.bf16.vlgmr.msra.gmra.mxu0 %vm1047_vm5, %v2918_v51  ;;  %2923 = vmatmul.mubr.msk.bf16.vlgmr.msra.gmra.mxu1 %vm1047_vm5, %v2921_v43 }
 0x2de   : > { %1855 = vmatpush1.bf16.msra.mxu0 %v1835_v53  ;;  %1911 = vmatpush1.bf16.msra.mxu1 %v1891_v54 }
 0x2df   : > { %1872 = vmatprep.mubr.bf16.mxu0 %v3309_v49  ;;  %1928 = vmatprep.mubr.bf16.mxu1 %v3309_v49 }
 0x2e0   : > { %2931 = vmatprep.subr.msk.bf16.mxu0 %vm1051_vm11, %v1950_v57  ;;  %2934 = vmatprep.subr.msk.bf16.mxu1 %vm1051_vm11, %v2014_v58 }
 0x2e5   : > { %2926 = vmatmul.mubr.msk.bf16.vlgmr.msra.gmra.mxu0 %vm1047_vm5, %v2924_v8  ;;  %2929 = vmatmul.mubr.msk.bf16.vlgmr.msra.gmra.mxu1 %vm1047_vm5, %v2927_v9 }
 0x2e6   : > { %1975 = vmatpush1.bf16.msra.mxu0 %v1955_v10  ;;  %2039 = vmatpush1.bf16.msra.mxu1 %v2019_v11 }
 0x2e7   : > { %1992 = vmatprep.mubr.bf16.mxu0 %v3309_v49  ;;  %2056 = vmatprep.mubr.bf16.mxu1 %v3309_v49 }
 0x2e8   : > { %2937 = vmatprep.subr.msk.bf16.mxu0 %vm1051_vm11, %v2078_v12  ;;  %2940 = vmatprep.subr.msk.bf16.mxu1 %vm1051_vm11, %v2142_v15 }
 0x2ed   : > { %2932 = vmatmul.mubr.msk.bf16.vlgmr.msra.gmra.mxu0 %vm1047_vm5, %v2930_v18  ;;  %2935 = vmatmul.mubr.msk.bf16.vlgmr.msra.gmra.mxu1 %vm1047_vm5, %v2933_v19 }
 0x2ee   : > { %2103 = vmatpush1.bf16.msra.mxu0 %v2083_v20  ;;  %2167 = vmatpush1.bf16.msra.mxu1 %v2147_v21 }
 0x2ef   : > { %2120 = vmatprep.mubr.bf16.mxu0 %v3309_v49  ;;  %2184 = vmatprep.mubr.bf16.mxu1 %v3309_v49 }
 0x2f5   : > { %2938 = vmatmul.mubr.msk.bf16.vlgmr.msra.gmra.mxu0 %vm1047_vm5, %v2936_v22  ;;  %2941 = vmatmul.mubr.msk.bf16.vlgmr.msra.gmra.mxu1 %vm1047_vm5, %v2939_v23 }
 0x2f6   : > { %2269 = vmatprep.mubr.bf16.mxu0 %v3309_v49  ;;  %2319 = vmatprep.mubr.bf16.mxu1 %v3309_v49 }
 0x375   : > { %v1092_v25 = vpop.f32.mrf.mxu0  ;;  %v1142_v26 = vpop.f32.mrf.mxu1 }
 0x376   : > { %v1143_v46 = vadd.f32 %v1142_v26, %v1092_v25 }
 0x377   : > { %v1094_v28 = vpop.f32.mrf.mxu0  ;;  %v1144_v29 = vpop.f32.mrf.mxu1 }
 0x378   : > { %v1145_v54 = vadd.f32 %v1144_v29, %v1094_v28 }
 0x379   : > { %v1096_v30 = vpop.f32.mrf.mxu0  ;;  %v1146_v31 = vpop.f32.mrf.mxu1 }
 0x37b   : > { %v1097_v32 = vpop.f32.mrf.mxu0  ;;  %v1147_v33 = vpop.f32.mrf.mxu1 }
 0x37d   : > { %v1211_v34 = vpop.f32.mrf.mxu0  ;;  %v1280_v35 = vpop.f32.mrf.mxu1 }
 0x37e   : > { %v1218_v57 = vadd.f32 %v1211_v34, %v1143_v46 }
 0x37f   : > { %v1213_v52 = vpop.f32.mrf.mxu0  ;;  %v1282_v36 = vpop.f32.mrf.mxu1 }
 0x380   : > { %v1219_v61 = vadd.f32 %v1213_v52, %v1145_v54  ;;  %v1287_v1 = vadd.f32 %v1280_v35, %v1218_v57 }
 0x381   : > { %v1215_v37 = vpop.f32.mrf.mxu0  ;;  %v1284_v38 = vpop.f32.mrf.mxu1 }
 0x382   : > { %v1288_v6 = vadd.f32 %v1282_v36, %v1219_v61 }
 0x383   : > { %v1216_v39 = vpop.f32.mrf.mxu0  ;;  %v1285_v40 = vpop.f32.mrf.mxu1 }
 0x385   : > { %v1336_v41 = vpop.f32.mrf.mxu0  ;;  %v1405_v42 = vpop.f32.mrf.mxu1 }
 0x386   : > { %v1343_v7 = vadd.f32 %v1336_v41, %v1287_v1 }
 0x387   : > { %v1338_v51 = vpop.f32.mrf.mxu0  ;;  %v1407_v43 = vpop.f32.mrf.mxu1 }
 0x388   : > { %v1344_v10 = vadd.f32 %v1338_v51, %v1288_v6  ;;  %v1412_v13 = vadd.f32 %v1405_v42, %v1343_v7 }
 0x389   : > { %v1340_v44 = vpop.f32.mrf.mxu0  ;;  %v1409_v45 = vpop.f32.mrf.mxu1 }
 0x38a   : > { %v1413_v17 = vadd.f32 %v1407_v43, %v1344_v10 }
 0x38b   : > { %v1341_v50 = vpop.f32.mrf.mxu0  ;;  %v1410_v53 = vpop.f32.mrf.mxu1 }
 0x38d   : > { %v1476_v58 = vpop.f32.mrf.mxu0  ;;  %v1545_v14 = vpop.f32.mrf.mxu1 }
 0x38e   : > { %v1483_v47 = vadd.f32 %v1476_v58, %v1412_v13 }
 0x38f   : > { %v1478_v63 = vpop.f32.mrf.mxu0  ;;  %v1547_v0 = vpop.f32.mrf.mxu1 }
 0x390   : > { %v1484_v20 = vadd.f32 %v1478_v63, %v1413_v17  ;;  %v1552_v23 = vadd.f32 %v1545_v14, %v1483_v47 }
 0x391   : > { %v1480_v5 = vpop.f32.mrf.mxu0  ;;  %v1549_v48 = vpop.f32.mrf.mxu1 }
 0x392   : > { %v1553_v28 = vadd.f32 %v1547_v0, %v1484_v20 }
 0x393   : > { %v1481_v8 = vpop.f32.mrf.mxu0  ;;  %v1550_v9 = vpop.f32.mrf.mxu1 }
 0x395   : > { %v1616_v11 = vpop.f32.mrf.mxu0  ;;  %v1682_v12 = vpop.f32.mrf.mxu1 }
 0x396   : > { %v1623_v29 = vadd.f32 %v1616_v11, %v1552_v23 }
 0x397   : > { %v1618_v15 = vpop.f32.mrf.mxu0  ;;  %v1684_v16 = vpop.f32.mrf.mxu1 }
 0x398   : > { %v1624_v32 = vadd.f32 %v1618_v15, %v1553_v28  ;;  %v1689_v35 = vadd.f32 %v1682_v12, %v1623_v29 }
 0x399   : > { %v1620_v18 = vpop.f32.mrf.mxu0  ;;  %v1686_v19 = vpop.f32.mrf.mxu1 }
 0x39a   : > { %v1690_v37 = vadd.f32 %v1684_v16, %v1624_v32  ;;  %v2199_v16 = vpop.permute.xlu1 %2198  ;;  %v2768_v32 = vld [vmem:[%s4000_s8] sm:$0xf] }
 0x39b   : > { %v1621_v21 = vpop.f32.mrf.mxu0  ;;  %v1687_v22 = vpop.f32.mrf.mxu1 }
 0x39d   : > { %v1746_v25 = vpop.f32.mrf.mxu0  ;;  %v1810_v26 = vpop.f32.mrf.mxu1 }
 0x39e   : > { %v1753_v38 = vadd.f32 %v1746_v25, %v1689_v35 }
 0x39f   : > { %v1748_v30 = vpop.f32.mrf.mxu0  ;;  %v1812_v31 = vpop.f32.mrf.mxu1 }
 0x3a0   : > { %v1754_v41 = vadd.f32 %v1748_v30, %v1690_v37  ;;  %v1817_v43 = vadd.f32 %v1810_v26, %v1753_v38 }
 0x3a1   : > { %v1750_v33 = vpop.f32.mrf.mxu0  ;;  %v1814_v34 = vpop.f32.mrf.mxu1 }
 0x3a2   : > { %v1818_v46 = vadd.f32 %v1812_v31, %v1754_v41 }
 0x3a3   : > { %v1751_v52 = vpop.f32.mrf.mxu0  ;;  %v1815_v36 = vpop.f32.mrf.mxu1 }
 0x3a5   : > { %v1874_v39 = vpop.f32.mrf.mxu0  ;;  %v1930_v40 = vpop.f32.mrf.mxu1 }
 0x3a6   : > { %v1881_v50 = vadd.f32 %v1874_v39, %v1817_v43 }
 0x3a7   : > { %v1876_v42 = vpop.f32.mrf.mxu0  ;;  %v1932_v51 = vpop.f32.mrf.mxu1 }
 0x3a8   : > { %v1882_v57 = vadd.f32 %v1876_v42, %v1818_v46  ;;  %v1937_v61 = vadd.f32 %v1930_v40, %v1881_v50 }
 0x3a9   : > { %v1878_v44 = vpop.f32.mrf.mxu0  ;;  %v1934_v45 = vpop.f32.mrf.mxu1 }
 0x3aa   : > { %v1938_v1 = vadd.f32 %v1932_v51, %v1882_v57 }
 0x3ab   : > { %v1879_v53 = vpop.f32.mrf.mxu0  ;;  %v1935_v54 = vpop.f32.mrf.mxu1 }
 0x3ad   : > { %v1994_v58 = vpop.f32.mrf.mxu0  ;;  %v2058_v14 = vpop.f32.mrf.mxu1 }
 0x3ae   : > { %v2001_v5 = vadd.f32 %v1994_v58, %v1937_v61 }
 0x3af   : > { %v1996_v63 = vpop.f32.mrf.mxu0  ;;  %v2060_v0 = vpop.f32.mrf.mxu1 }
 0x3b0   : > { %v2002_v7 = vadd.f32 %v1996_v63, %v1938_v1  ;;  %v2065_v10 = vadd.f32 %v2058_v14, %v2001_v5 }
 0x3b1   : > { %v1998_v48 = vpop.f32.mrf.mxu0  ;;  %v2062_v6 = vpop.f32.mrf.mxu1 }
 0x3b2   : > { %v2066_v13 = vadd.f32 %v2060_v0, %v2002_v7 }
 0x3b3   : > { %v1999_v8 = vpop.f32.mrf.mxu0  ;;  %v2063_v9 = vpop.f32.mrf.mxu1 }
 0x3b5   : > { %v2122_v11 = vpop.f32.mrf.mxu0  ;;  %v2186_v12 = vpop.f32.mrf.mxu1 }
 0x3b6   : > { %v2129_v15 = vadd.f32 %v2122_v11, %v2065_v10 }
 0x3b7   : > { %v2124_v17 = vpop.f32.mrf.mxu0  ;;  %v2188_v47 = vpop.f32.mrf.mxu1 }
 0x3b8   : > { %v2193_v18 = vadd.f32 %v2186_v12, %v2129_v15  ;;  %v2130_v19 = vadd.f32 %v2124_v17, %v2066_v13  ;;  %v2205_v15 = vld [vmem:[%s3998_s6] sm:$0x3] }
 0x3b9   : > { %v2126_v20 = vpop.f32.mrf.mxu0  ;;  %v2190_v21 = vpop.f32.mrf.mxu1 }
 0x3ba   : > { %v2194_v22 = vadd.f32 %v2188_v47, %v2130_v19  ;;  %v2201_v23 = vadd.f32 %v2199_v16, %v2193_v18 }
 0x3bb   : > { %v2127_v25 = vpop.f32.mrf.mxu0  ;;  %v2191_v26 = vpop.f32.mrf.mxu1 }
 0x3bc   : > { %v2202_v28 = vadd.f32 %v2199_v16, %v2194_v22  ;;  %v3816_v29 = vmax.f32 %v2201_v23, 0.0 }
 0x3be   : > { %v3818_v30 = vmax.f32 %v2202_v28, 0.0 }
 0x3c0   : > { %v3200_v31 = vpack.i.bf16 %v3818_v30, %v3816_v29  ;;  %v2459_v3 = vpack.c.bf16 %v3818_v30, %v3818_v30 }
 0x3c2   : > { %3201 = vrot.lane.b32.xlu1 %v3200_v31, %s3310_s29  ;;  %3196 = vrot.lane.b32.xlu0 %v3200_v31, %s3305_s24 }
 0x3c6   : > { %3211 = vrot.lane.b32.xlu1 %v3200_v31, %s3311_s21  ;;  %3206 = vrot.lane.b32.xlu0 %v3200_v31, %s3312_s22  ;;  %s3316_s22 = smov [#allocation2]  }
 0x3ca   : > { %3221 = vrot.lane.b32.xlu1 %v3200_v31, %s3313_s23  ;;  %3216 = vrot.lane.b32.xlu0 %v3200_v31, %s3314_s25  ;;  %s338_s25 = sand.u32 1, %s3289_s10   ;;  %s3241_s23 = sshll.u32 %s3316_s22, 4  ;;  %s3242_s23 = int_to_ptr.vmem [resolvable:$false] %s3241_s23 }
 0x3cb   : > { %s2784_s29 = scalar_lea.sflag [#allocation3], %s338_s25  ;;  %s3243_s13 = scalar_lea.vmem %s3242_s23, 256 }
 0x3ce   : > { %3231 = vrot.lane.b32.xlu1 %v3200_v31, %s3315_s26  ;;  %3226 = vrot.lane.b32.xlu0 %v3200_v31, %s3308_s27  ;;  %s2873_s26 = sshll.u32 %s338_s25, 3  ;;  %s2796_s27 = scalar_lea.hbm %s4001_s9, %s2975_s28 }
 0x3cf   : > { %s340_s14 = scalar_lea.vmem [#allocation2], %s2873_s26 }
 0x3d0   : > { %s2798_s16 = sshll.u32 %s340_s14, 4  ;;  %s2799_s16 = int_to_ptr.vmem [resolvable:$true] %s2798_s16 }
 0x3d1   : > { %s3237_s21 = scalar_lea.vmem %s2799_s16, 128  ;;  %p3244_p0 = scmp.lt.s32.totalorder %s2799_s16, %s3242_s23 }
 0x3d2   : > { %2771 = vperm.xlu0 %3235, %v2768_v32   ;;  %p3238_p11 = scmp.ne.s32.totalorder %s2799_s16, %s3237_s21  ;;  %p3245_p1 = scmp.lt.s32.totalorder %s3243_s13, %s3237_s21 }
 0x3d4   : > { %p3239_p12 = pnand %p3238_p11, %p3405_p5  ;;  %p3246_p2 = por %p3245_p1, %p3244_p0 }
 0x3d6   : > { %p3240_p13 = pneg %p3239_p12 }
 0x3d8   : > { %p3247_p3 = pnand %p3246_p2, %p3240_p13 }
 0x434   : > { %v3202_v33 = vpop.permute.xlu1 %3201  ;;  %v3197_v34 = vpop.permute.xlu0 %3196 }
 0x435   : > { %v3204_v35 = vunpack.i.h.bf16 %v3202_v33  ;;  %v3203_v52 = vunpack.i.l.bf16 %v3202_v33  ;;  %v3199_v36 = vunpack.i.h.bf16 %v3197_v34  ;;  %v3198_v37 = vunpack.i.l.bf16 %v3197_v34 }
 0x437   : > { %v2210_v38 = vsel %vm4035_vm10, %v3203_v52, %v3204_v35  ;;  %v2211_v39 = vsel %vm4036_vm13, %v3204_v35, %v3203_v52  ;;  %v2222_v40 = vsel %vm4037_vm15, %v3198_v37, %v3199_v36  ;;  %v2223_v41 = vsel %vm4038_vm8, %v3199_v36, %v3198_v37 }
 0x438   : > { %v2213_v42 = vsel %vm3510_vm12, %v2210_v38, 0.0  ;;  %v2227_v51 = vpack.c.bf16 %v2222_v40, %v2222_v40  ;;  %v3212_v43 = vpop.permute.xlu1 %3211  ;;  %v3207_v44 = vpop.permute.xlu0 %3206  ;;  %v2212_v45 = vsel %vm3521_vm0, %v2211_v39, 0.0  ;;  %vm4039_vm10 = vcmp.ge.s32.totalorder %v3497_v55, 16  ;;  %v2947_v39 = vld [vmem:[%s3998_s6 + $0x4] sm:$0x3] }
 0x439   : > { %v2224_v46 = vsel %vm4039_vm10, %v2223_v41, 0.0  ;;  %v3214_v50 = vunpack.i.h.bf16 %v3212_v43  ;;  %v3213_v53 = vunpack.i.l.bf16 %v3212_v43  ;;  %v3209_v54 = vunpack.i.h.bf16 %v3207_v44 }
 0x43a   : > { %v3208_v57 = vunpack.i.l.bf16 %v3207_v44  ;;  %2943 = vmatprep.subr.msk.bf16.mxu0 %vm1051_vm11, %v2227_v51  ;;  %v2215_v58 = vpack.c.bf16 %v2213_v42, %v2213_v42  ;;  %v2214_v14 = vpack.c.bf16 %v2212_v45, %v2212_v45  ;;  %v2226_v61 = vpack.c.bf16 %v2224_v46, %v2224_v46 }
 0x43b   : > { %vm4040_vm8 = vcmp.lt.s32.totalorder %v3497_v55, 1  ;;  %vm4042_vm0 = vcmp.lt.s32.totalorder %v3497_v55, 15  ;;  %v2458_v36 = vpack.c.bf16 %v3816_v29, %v3816_v29 }
 0x43c   : > { %v2398_v63 = vsel %vm4040_vm8, %v3213_v53, %v3214_v50  ;;  %vm4041_vm13 = vmmov %vm4040_vm8  ;;  %v2334_v2 = vsel %vm4042_vm0, %v3208_v57, %v3209_v54  ;;  %2945 = vmatprep.subr.msk.bf16.mxu1 %vm1051_vm11, %v2215_v58  ;;  %v3222_v6 = vpop.permute.xlu1 %3221  ;;  %v2282_v7 = vsel %vm1051_vm11, %v2214_v14, 0  ;;  %v3217_v8 = vpop.permute.xlu0 %3216  ;;  %v2232_v9 = vsel %vm1051_vm11, %v2226_v61, 0 }
 0x43d   : > { %v2399_v0 = vsel %vm4041_vm13, %v3214_v50, %v3213_v53  ;;  %vm4043_vm15 = vmmov %vm4042_vm0  ;;  %v2401_v5 = vsel %vm3510_vm12, %v2398_v63, 0.0  ;;  %v2337_v48 = vsel %vm3525_vm1, %v2334_v2, 0.0  ;;  %v3224_v10 = vunpack.i.h.bf16 %v3222_v6  ;;  %2302 = vmatpush1.bf16.msra.mxu1 %v2282_v7  ;;  %2252 = vmatpush1.bf16.msra.mxu0 %v2232_v9  ;;  %v2962_v2 = vld [vmem:[%s3998_s6 + $0xe] sm:$0x3] }
 0x43e   : > { %v2335_v1 = vsel %vm4043_vm15, %v3209_v54, %v3208_v57  ;;  %v3223_v11 = vunpack.i.l.bf16 %v3222_v6  ;;  %v3219_v12 = vunpack.i.h.bf16 %v3217_v8  ;;  %v3218_v13 = vunpack.i.l.bf16 %v3217_v8  ;;  %v2953_v54 = vld [vmem:[%s3998_s6 + $0x8] sm:$0x3]  ;;  %v2956_v57 = vld [vmem:[%s3998_s6 + $0xa] sm:$0x3] }
 0x43f   : > { %v2339_v16 = vpack.c.bf16 %v2337_v48, %v2337_v48  ;;  %v2403_v17 = vpack.c.bf16 %v2401_v5, %v2401_v5  ;;  %v2400_v47 = vsel %vm3505_vm9, %v2399_v0, 0.0  ;;  %v2336_v18 = vsel %vm3562_vm6, %v2335_v1, 0.0  ;;  %v2959_v0 = vld [vmem:[%s3998_s6 + $0xc] sm:$0x3]  ;;  %v2965_v1 = vld [vmem:[%s3998_s6 + $0x10] sm:$0x3] }
 0x440   : > { %vm4044_vm12 = vcmp.lt.s32.totalorder %v3497_v55, 127  ;;  %2944 = vmatmul.mubr.msk.bf16.vlgmr.msra.gmra.mxu0 %vm1047_vm5, %v2942_v60  ;;  %2946 = vmatmul.mubr.msk.bf16.vlgmr.msra.gmra.mxu1 %vm1047_vm5, %v2205_v15  ;;  %v2402_v22 = vpack.c.bf16 %v2400_v47, %v2400_v47  ;;  %v3227_v23 = vpop.permute.xlu0 %3226  ;;  %v2338_v25 = vpack.c.bf16 %v2336_v18, %v2336_v18  ;;  %vm4046_vm8 = vcmp.lt.s32.totalorder %v3497_v55, 113  ;;  %v3232_v35 = vpop.permute.xlu1 %3231 }
 0x441   : > { %v2518_v19 = vsel %vm4044_vm12, %v3218_v13, %v3219_v12  ;;  %vm4045_vm10 = vmmov %vm4044_vm12  ;;  %v2583_v27 = vsel %vm4046_vm8, %v3224_v10, %v3223_v11  ;;  %2948 = vmatprep.subr.msk.bf16.mxu0 %vm1051_vm11, %v2339_v16  ;;  %2951 = vmatprep.subr.msk.bf16.mxu1 %vm1051_vm11, %v2403_v17  ;;  %v3229_v26 = vunpack.i.h.bf16 %v3227_v23  ;;  %v3228_v28 = vunpack.i.l.bf16 %v3227_v23 }
 0x442   : > { %v2519_v20 = vsel %vm4045_vm10, %v3219_v12, %v3218_v13  ;;  %v2408_v31 = vsel %vm1051_vm11, %v2402_v22, 0  ;;  %v2344_v32 = vsel %vm1051_vm11, %v2338_v25, 0  ;;  %2381 = vmatprep.mubr.bf16.mxu0 %v3309_v49  ;;  %2445 = vmatprep.mubr.bf16.mxu1 %v3309_v49  ;;  %v2520_v34 = vsel %vm3531_vm4, %v2518_v19, 0.0 }
 0x443   : > { %v2521_v21 = vsel %vm3525_vm1, %v2519_v20, 0.0  ;;  %2428 = vmatpush1.bf16.msra.mxu1 %v2408_v31  ;;  %v2647_v52 = vsel %vm1491_vm14, %v3229_v26, %v3228_v28  ;;  %2364 = vmatpush1.bf16.msra.mxu0 %v2344_v32  ;;  %v2522_v37 = vpack.c.bf16 %v2520_v34, %v2520_v34  ;;  %v2585_v38 = vsel %vm3603_vm3, %v2583_v27, 0.0  ;;  %vm4047_vm1 = vmmov %vm4046_vm8 }
 0x444   : > { %v2523_v33 = vpack.c.bf16 %v2521_v21, %v2521_v21  ;;  %v2649_v30 = vsel %vm1007_vm7, %v2647_v52, 0.0  ;;  %2954 = vmatprep.subr.msk.bf16.mxu0 %vm1051_vm11, %v2459_v3  ;;  %v2582_v40 = vsel %vm4047_vm1, %v3223_v11, %v3224_v10  ;;  %v3234_v41 = vunpack.i.h.bf16 %v3232_v35 }
 0x445   : > { %v3233_v42 = vunpack.i.l.bf16 %v3232_v35  ;;  %v2651_v51 = vpack.c.bf16 %v2649_v30, %v2649_v30  ;;  %v2464_v62 = vsel %vm1051_vm11, %v2458_v36, 0  ;;  %v2528_v29 = vsel %vm1051_vm11, %v2522_v37, 0 }
 0x446   : > { %2957 = vmatprep.subr.msk.bf16.mxu1 %vm1051_vm11, %v2523_v33  ;;  %v2587_v43 = vpack.c.bf16 %v2585_v38, %v2585_v38  ;;  %v2584_v44 = vsel %vm3505_vm9, %v2582_v40, 0.0  ;;  %v2646_v45 = vsel %vm1491_vm14, %v3228_v28, %v3229_v26  ;;  %vm4048_vm3 = vcmp.lt.s32.totalorder %v3497_v55, 111 }
 0x447   : > { %v2711_v46 = vsel %vm4048_vm3, %v3234_v41, %v3233_v42  ;;  %v2586_v50 = vpack.c.bf16 %v2584_v44, %v2584_v44  ;;  %v2650_v53 = vpack.c.bf16 %v2646_v45, %v2646_v45  ;;  %vm4049_vm9 = vmmov %vm4048_vm3 }
 0x448   : > { %2949 = vmatmul.mubr.msk.bf16.vlgmr.msra.gmra.mxu0 %vm1047_vm5, %v2947_v39  ;;  %2952 = vmatmul.mubr.msk.bf16.vlgmr.msra.gmra.mxu1 %vm1047_vm5, %v2950_v56  ;;  %v2713_v59 = vsel %vm3642_vm2, %v2711_v46, 0.0  ;;  %v2710_v58 = vsel %vm4049_vm9, %v3233_v42, %v3234_v41 }
 0x449   : > { %2484 = vmatpush1.bf16.msra.mxu0 %v2464_v62  ;;  %2548 = vmatpush1.bf16.msra.mxu1 %v2528_v29  ;;  %v2715_v14 = vpack.c.bf16 %v2713_v59, %v2713_v59  ;;  %v2592_v61 = vsel %vm1051_vm11, %v2586_v50, 0  ;;  %v2656_v24 = vsel %vm1051_vm11, %v2650_v53, 0  ;;  %v2712_v63 = vsel %vm3531_vm4, %v2710_v58, 0.0 }
 0x44a   : > { %2960 = vmatprep.subr.msk.bf16.mxu0 %vm1051_vm11, %v2587_v43  ;;  %2963 = vmatprep.subr.msk.bf16.mxu1 %vm1051_vm11, %v2651_v51  ;;  %v2714_v55 = vpack.c.bf16 %v2712_v63, %v2712_v63 }
 0x44b   : > { %2501 = vmatprep.mubr.bf16.mxu0 %v3309_v49  ;;  %2565 = vmatprep.mubr.bf16.mxu1 %v3309_v49 }
 0x44c   : > { %v2720_v4 = vsel %vm1051_vm11, %v2714_v55, 0 }
 0x44d   : > { %v2772_v44 = vpop.permute.xlu0 %2771 }
 0x450   : > { %2955 = vmatmul.mubr.msk.bf16.vlgmr.msra.gmra.mxu0 %vm1047_vm5, %v2953_v54  ;;  %2958 = vmatmul.mubr.msk.bf16.vlgmr.msra.gmra.mxu1 %vm1047_vm5, %v2956_v57 }
 0x451   : > { %2612 = vmatpush1.bf16.msra.mxu0 %v2592_v61  ;;  %2676 = vmatpush1.bf16.msra.mxu1 %v2656_v24 }
 0x452   : > { %2966 = vmatprep.subr.msk.bf16.mxu0 %vm1051_vm11, %v2715_v14  ;;  %2629 = vmatprep.mubr.bf16.mxu0 %v3309_v49 }
 0x453   : > { %2693 = vmatprep.mubr.bf16.mxu1 %v3309_v49 }
 0x458   : > { %2961 = vmatmul.mubr.msk.bf16.vlgmr.msra.gmra.mxu0 %vm1047_vm5, %v2959_v0  ;;  %2964 = vmatmul.mubr.msk.bf16.vlgmr.msra.gmra.mxu1 %vm1047_vm5, %v2962_v2 }
 0x459   : > { %2740 = vmatpush1.bf16.msra.mxu0 %v2720_v4  ;;  %2757 = vmatprep.mubr.bf16.mxu0 %v3309_v49 }
 0x460   : > { %2967 = vmatmul.mubr.msk.bf16.vlgmr.msra.gmra.mxu0 %vm1047_vm5, %v2965_v1 }
 0x500   : > { %v2271_v5 = vpop.f32.mrf.mxu0  ;;  %v2321_v48 = vpop.f32.mrf.mxu1 }
 0x501   : > { %v2322_v17 = vadd.f32 %v2321_v48, %v2271_v5 }
 0x502   : > { %v2273_v6 = vpop.f32.mrf.mxu0  ;;  %v2323_v7 = vpop.f32.mrf.mxu1 }
 0x503   : > { %v2324_v19 = vadd.f32 %v2323_v7, %v2273_v6 }
 0x504   : > { %v2275_v8 = vpop.f32.mrf.mxu0  ;;  %v2325_v9 = vpop.f32.mrf.mxu1 }
 0x506   : > { %v2276_v10 = vpop.f32.mrf.mxu0  ;;  %v2326_v11 = vpop.f32.mrf.mxu1 }
 0x508   : > { %v2383_v12 = vpop.f32.mrf.mxu0  ;;  %v2447_v13 = vpop.f32.mrf.mxu1 }
 0x509   : > { %v2390_v20 = vadd.f32 %v2383_v12, %v2322_v17 }
 0x50a   : > { %v2385_v60 = vpop.f32.mrf.mxu0  ;;  %v2449_v15 = vpop.f32.mrf.mxu1 }
 0x50b   : > { %v2391_v23 = vadd.f32 %v2385_v60, %v2324_v19  ;;  %v2454_v26 = vadd.f32 %v2447_v13, %v2390_v20 }
 0x50c   : > { %v2387_v16 = vpop.f32.mrf.mxu0  ;;  %v2451_v49 = vpop.f32.mrf.mxu1 }
 0x50d   : > { %v2455_v31 = vadd.f32 %v2449_v15, %v2391_v23 }
 0x50e   : > { %v2388_v47 = vpop.f32.mrf.mxu0  ;;  %v2452_v18 = vpop.f32.mrf.mxu1 }
 0x510   : > { %v2503_v21 = vpop.f32.mrf.mxu0  ;;  %v2567_v22 = vpop.f32.mrf.mxu1 }
 0x511   : > { %v2510_v32 = vadd.f32 %v2503_v21, %v2454_v26 }
 0x512   : > { %v2505_v25 = vpop.f32.mrf.mxu0  ;;  %v2569_v27 = vpop.f32.mrf.mxu1 }
 0x513   : > { %v2511_v35 = vadd.f32 %v2505_v25, %v2455_v31  ;;  %v2574_v36 = vadd.f32 %v2567_v22, %v2510_v32 }
 0x514   : > { %v2507_v28 = vpop.f32.mrf.mxu0  ;;  %v2571_v3 = vpop.f32.mrf.mxu1 }
 0x515   : > { %v2575_v39 = vadd.f32 %v2569_v27, %v2511_v35 }
 0x516   : > { %v2508_v33 = vpop.f32.mrf.mxu0  ;;  %v2572_v34 = vpop.f32.mrf.mxu1 }
 0x518   : > { %v2631_v52 = vpop.f32.mrf.mxu0  ;;  %v2695_v30 = vpop.f32.mrf.mxu1 }
 0x519   : > { %v2638_v56 = vadd.f32 %v2631_v52, %v2574_v36 }
 0x51a   : > { %v2633_v37 = vpop.f32.mrf.mxu0  ;;  %v2697_v38 = vpop.f32.mrf.mxu1 }
 0x51b   : > { %v2639_v42 = vadd.f32 %v2633_v37, %v2575_v39  ;;  %v2702_v29 = vadd.f32 %v2695_v30, %v2638_v56 }
 0x51c   : > { %v2635_v40 = vpop.f32.mrf.mxu0  ;;  %v2699_v41 = vpop.f32.mrf.mxu1 }
 0x51d   : > { %v2703_v45 = vadd.f32 %v2697_v38, %v2639_v42 }
 0x51e   : > { %v2636_v51 = vpop.f32.mrf.mxu0  ;;  %v2700_v62 = vpop.f32.mrf.mxu1 }
 0x520   : > { %v2759_v43 = vpop.f32.mrf.mxu0 }
 0x521   : > { %v2766_v46 = vadd.f32 %v2759_v43, %v2702_v29 }
 0x522   : > { %v2761_v50 = vpop.f32.mrf.mxu0 }
 0x523   : > { %v2774_v53 = vadd.f32 %v2772_v44, %v2766_v46  ;;  %v2767_v59 = vadd.f32 %v2761_v50, %v2703_v45 }
 0x524   : > { %v2763_v54 = vpop.f32.mrf.mxu0 }
 0x525   : > { %v2775_v57 = vadd.f32 %v2772_v44, %v2767_v59  ;;  %v2776_v14 = vmax.f32 %v2774_v53, 0.0 }
 0x526   : > { %v2764_v58 = vpop.f32.mrf.mxu0 }
 0x527   : > { %v2777_v61 = vmax.f32 %v2775_v57, 0.0 }
 0x529   : > { %v2780_v24 = vcombine.low %v2776_v14, %v2777_v61 }
 0x52b   : > { %2782 = vst [vmem:[%s340_s14] sm:$0xff] %v2780_v24 }
 0x52c   : > { %3250 = shalt.err (!%p3247_p3)
}
 0x52d   : > { %s3251_s26 = scalar_lea.hbm %s2796_s27, 128  ;;  %s3255_s14 = scalar_lea.hbm %s4001_s9, 256 }
 0x52e   : > { %p3252_p4 = scmp.ne.s32.totalorder %s2796_s27, %s3251_s26  ;;  %p3256_p9 = scmp.lt.s32.totalorder %s2796_s27, %s4001_s9 }
 0x52f   : > { %p3257_p10 = scmp.lt.s32.totalorder %s3255_s14, %s3251_s26 }
 0x530   : > { %p3253_p7 = pnand %p3252_p4, %p3405_p5 }
 0x531   : > { %p3258_p11 = por %p3257_p10, %p3256_p9 }
 0x532   : > { %p3254_p8 = pneg %p3253_p7 }
 0x534   : > { %p3259_p12 = pnand %p3258_p11, %p3254_p8 }
 0x536   : > { %3262 = shalt.err (!%p3259_p12)
}
 0x537   : > { %3023 = dma.vmem_to_hbm [thread:$0]  (%p3405_p5), %s2799_s16, 128, %s2796_s27, %s2784_s29  }
 0x538 PF: > { %p3029_p13 = scmp.ge.s32.totalorder %s3297_s12, 2  ;;  %s2810_s21 = sand.u32 1, %s3285_s30  }
 0x539   : > { %s2811_s22 = scalar_lea.sflag [#allocation3], %s2810_s21 }
 0x53a   : > { %p3026_p0 = pnand %p3029_p13, %p3409_p6 }
 0x53c   : > { %p3027_p1 = pneg %p3026_p0 }
 0x53e   : > { %3280 = dma.done.wait (%p3027_p1), %s2811_s22, 128  }
 0x53f   : > { %3282 = vsyncadd (%p3027_p1), %s2811_s22, 4294967168  ;;  %p19_p2 = scmp.ge.s32.totalorder %s3392_s15, 4   ;;  %s4050_s30 = smov %s3289_s10 }
 0x540   : > { %s4051_s10 = smov %s3293_s11  ;;  %s4052_s11 = smov %s3403_s18 }
 0x541   : > { %s4053_s12 = smov %s3392_s15  ;;  %21 = sbr.rel (!%p19_p2) target bundleno = 3 (0x3), region = 118 }
 0x546   :  { %2816 = vsyncpa [#allocation3], 1 }
 0x547   :  { %2818 = vsyncpa [#allocation3 + $0x1], 1 }

</bundles_post_ra>
